<compile_context>
chip_gen: v6e
topology: v6e:2x2x1
jax: 0.10.0
libtpu: 0.0.40
codegen_flags: <defaults>
</compile_context>

<pallas_src>
from functools import partial

import jax
import jax.numpy as jnp
from jax.experimental import pallas as pl
from jax.experimental.pallas import tpu as pltpu


# -------------------- fused patch-embedding GEMM kernel ---------------------
def _patch_embed_matmul_kernel(p_ref, w_ref, b_ref, o_ref):
    # p_ref: (tm, K) patch block, w_ref: (K, N) weight, b_ref: (1, N) bias.
    acc = jnp.dot(p_ref[...], w_ref[...], preferred_element_type=jnp.float32)
    o_ref[...] = (acc + b_ref[...]).astype(o_ref.dtype)


def _pick_m_tile(m):
    """Largest MXU-friendly row tile that divides M (keeps blocks VMEM-safe
    on v7x while still pipelining / megacore-sharding the grid)."""
    for cand in (1024, 768, 512, 384, 256, 128):
        if m % cand == 0:
            return cand
    return m  # tiny / ragged fallback: single block


# ----------------------------- PatchEmbed forward ---------------------------
@partial(jax.jit, static_argnames=("patch_size",))
def patch_embed_forward(x, w_conv, b_conv, patch_size=(2, 2)):
    """x: (B, C, H, W); w_conv: (E, C, ph, pw) [PyTorch Conv2d layout];
    b_conv: (E,).  Returns (B, num_patches, E)."""
    B, C, H, W = x.shape
    E = w_conv.shape[0]
    ph, pw = patch_size
    assert H % ph == 0 and W % pw == 0, "image size must be divisible by patch"
    Hp, Wp = H // ph, W // pw
    num_patches = Hp * Wp

    # --- patchify (layout plumbing, done once in XLA; feature order = (c,i,j)
    #     row-major, matching Conv2d weight flattening) ---
    patches = x.reshape(B, C, Hp, ph, Wp, pw)
    patches = patches.transpose(0, 2, 4, 1, 3, 5)             # (B, Hp, Wp, C, ph, pw)
    patches = patches.reshape(B * num_patches, C * ph * pw)   # (M, K)

    w2 = w_conv.reshape(E, C * ph * pw).T                     # (K, N)
    b2 = b_conv.reshape(1, E)                                  # (1, N)

    M, K = patches.shape
    N = E
    tm = _pick_m_tile(M)

    out = pl.pallas_call(
        _patch_embed_matmul_kernel,
        out_shape=jax.ShapeDtypeStruct((M, N), x.dtype),
        grid=(M // tm,),
        in_specs=[
            pl.BlockSpec((tm, K), lambda i: (i, 0)),   # patch rows: tiled along M
            pl.BlockSpec((K, N), lambda i: (0, 0)),    # weight: resident every step
            pl.BlockSpec((1, N), lambda i: (0, 0)),    # bias
        ],
        out_specs=pl.BlockSpec((tm, N), lambda i: (i, 0)),     # lane-dense (N=768)
        compiler_params=pltpu.CompilerParams(
            dimension_semantics=("parallel",),         # megacore-shardable on v7x
        ),
    )(patches, w2, b2)

    return out.reshape(B, num_patches, E)


# ------------------------------ pure-JAX reference --------------------------
def patch_embed_ref(x, w_conv, b_conv, patch_size=(2, 2)):
    out = jax.lax.conv_general_dilated(
        x, w_conv, window_strides=patch_size, padding="VALID",
        dimension_numbers=("NCHW", "OIHW", "NCHW"),
        precision=jax.lax.Precision.HIGHEST)
    out = out + b_conv[None, :, None, None]
    B, E, Hp, Wp = out.shape
    return out.reshape(B, E, Hp * Wp).transpose(0, 2, 1)       # flatten(2).transpose(1,2)


if __name__ == "__main__":
    # Module defaults: img_size=48, patch_size=2, in_chans=64, embed_dim=768.
    B, C, img, patch, E = 2, 64, 48, 2, 768

    key = jax.random.PRNGKey(0)
    kx, kw, kb = jax.random.split(key, 3)
    x = jax.random.normal(kx, (B, C, img, img), dtype=jnp.float32)
    w_conv = 0.05 * jax.random.normal(kw, (E, C, patch, patch), dtype=jnp.float32)
    b_conv = 0.05 * jax.random.normal(kb, (E,), dtype=jnp.float32)

    y = jax.block_until_ready(patch_embed_forward(x, w_conv, b_conv, (patch, patch)))
    y_ref = patch_embed_ref(x, w_conv, b_conv, (patch, patch))

    num_patches = (img // patch) * (img // patch)
    assert y.shape == (B, num_patches, E)
    assert jnp.allclose(y, y_ref, atol=2e-3, rtol=2e-3)
    print("KERNEL_OK")
</pallas_src>

<mosaic_0001>
module attributes {stable_mosaic.version = 11 : i64} {
  func.func @_patch_embed_matmul_kernel(%arg0: i32, %arg1: memref<384x256xf32, #tpu.memory_space<vmem>>, %arg2: memref<256x768xf32, #tpu.memory_space<vmem>>, %arg3: memref<1x768xf32, #tpu.memory_space<vmem>>, %arg4: memref<384x768xf32, #tpu.memory_space<vmem>>) attributes {dimension_semantics = [#tpu.dimension_semantics<parallel>], iteration_bounds = array<i64: 3>, scalar_prefetch = 0 : i64, scratch_operands = 0 : i64, tpu.core_type = #tpu.core_type<tc>, window_params = [{transform_indices = @transform_0, window_bounds = array<i64: 384, 256>}, {pipeline_mode = #tpu.pipeline_mode<synchronous>, transform_indices = @transform_1, window_bounds = array<i64: 256, 768>}, {pipeline_mode = #tpu.pipeline_mode<synchronous>, transform_indices = @transform_2, window_bounds = array<i64: 1, 768>}, {transform_indices = @transform_3, window_bounds = array<i64: 384, 768>}]} {
    %c0 = arith.constant 0 : index
    %c0_0 = arith.constant 0 : index
    %0 = vector.load %arg1[%c0, %c0_0] : memref<384x256xf32, #tpu.memory_space<vmem>>, vector<384x256xf32>
    %c0_1 = arith.constant 0 : index
    %c0_2 = arith.constant 0 : index
    %1 = vector.load %arg2[%c0_1, %c0_2] : memref<256x768xf32, #tpu.memory_space<vmem>>, vector<256x768xf32>
    %cst = arith.constant dense<0.000000e+00> : vector<384x768xf32>
    %2 = tpu.matmul %0, %1, %cst {dimension_numbers = #tpu.dot_dimension_numbers<[1], [0], [0], [1], [0, 0, 1, 1], [], []>} : vector<384x256xf32>, vector<256x768xf32>, vector<384x768xf32> -> vector<384x768xf32>
    %c0_3 = arith.constant 0 : index
    %c0_4 = arith.constant 0 : index
    %3 = vector.load %arg3[%c0_3, %c0_4] : memref<1x768xf32, #tpu.memory_space<vmem>>, vector<1x768xf32>
    %4 = vector.broadcast %3 : vector<1x768xf32> to vector<384x768xf32>
    %5 = arith.addf %2, %4 : vector<384x768xf32>
    %c0_5 = arith.constant 0 : index
    %c0_6 = arith.constant 0 : index
    %6 = vector.load %arg4[%c0_5, %c0_6] : memref<384x768xf32, #tpu.memory_space<vmem>>, vector<384x768xf32>
    tpu.vector_store %arg4[%c0_5, %c0_6], %5 {strides = array<i32>} : memref<384x768xf32, #tpu.memory_space<vmem>>, vector<384x768xf32>,
    return
  }
  func.func @transform_0(%arg0: i32) -> (i32, i32) {
    %c0_i32 = arith.constant 0 : i32
    %c0_i32_0 = arith.constant 0 : i32
    return %arg0, %c0_i32 : i32, i32
  }
  func.func @transform_1(%arg0: i32) -> (i32, i32) {
    %c0_i32 = arith.constant 0 : i32
    %c0_i32_0 = arith.constant 0 : i32
    %c0_i32_1 = arith.constant 0 : i32
    return %c0_i32, %c0_i32_0 : i32, i32
  }
  func.func @transform_2(%arg0: i32) -> (i32, i32) {
    %c0_i32 = arith.constant 0 : i32
    %c0_i32_0 = arith.constant 0 : i32
    %c0_i32_1 = arith.constant 0 : i32
    return %c0_i32, %c0_i32_0 : i32, i32
  }
  func.func @transform_3(%arg0: i32) -> (i32, i32) {
    %c0_i32 = arith.constant 0 : i32
    %c0_i32_0 = arith.constant 0 : i32
    return %arg0, %c0_i32 : i32, i32
  }
}

</mosaic_0001>

<bundles_post_ra>
// kernel: patch_embed_forward.1
= control target key start
LH: loop header
LB: loop body
LE: loop exit
PB: predicated region body
PF: predicated region fallthrough
CT: control target
= control target key end

     0   :  { %8 = vsyncpa [#allocation3], 0  ;;  %s3882_s0 = inlined_call_operand.vmem [shape: f32[1152,256], index: 0, kind: input, shape index: {}]   ;;  %s3883_s1 = inlined_call_operand.vmem [shape: f32[256,768], index: 1, kind: input, shape index: {}]   ;;  %s3884_s2 = inlined_call_operand.vmem [shape: f32[1,768], index: 2, kind: input, shape index: {}]   ;;  %s3885_s3 = inlined_call_operand.hbm [shape: f32[1152,768], index: 3, kind: output, shape index: {}]  }
   0x1   :  { %10 = vsyncpa [#allocation3 + $0x1], 0  ;;  %s2161_s12 = smov 0   ;;  %s2163_s13 = smov 0  }
   0x2   :  { %s2165_s14 = smov 0   ;;  %s2167_s15 = smov 0  }
   0x3 LB: > { %s2182_s16 = sadd.s32 4294967295, %s2136_s15   ;;  %s1919_s17 = sadd.s32 4294967294, %s2136_s15   ;;  %s2136_s15 = sphi %s2167_s15, %s3895_s15   ;;  %s2132_s14 = sphi %s2165_s14, %s3894_s14   ;;  %s2128_s13 = sphi %s2163_s13, %s3893_s13   ;;  %s2124_s12 = sphi %s2161_s12, %s3892_s12  }
   0x4   : > { %s2186_s18 = sadd.s32 1, %s2136_s15   ;;  %s91_s19 = sadd.s32 1, %s2132_s14 }
   0x5   : > { %s88_s20 = ssub.s32 %s2136_s15, %s2186_s18  ;;  %p101_p0 = scmp.ne.s32.totalorder %s2132_s14, %s2128_s13 }
   0x6   : > { %p89_p1 = scmp.eq.s32.totalorder %s88_s20, 0  ;;  %p102_p2 = scmp.eq.s32.totalorder %s2182_s16, 2 }
   0x7   : > { %p107_p3 = scmp.ne.s32.totalorder %s2128_s13, %s2124_s12  ;;  %p108_p4 = scmp.eq.s32.totalorder %s1919_s17, 2 }
   0x8   : > { %s2197_s21 = scalar_select %p89_p1, %s2132_s14, %s91_s19  }
   0x9   : > { %p2199_p5 = por %p102_p2, %p101_p0  ;;  %p2203_p6 = por %p108_p4, %p107_p3 }
   0xa   : > { %p1922_p7 = scmp.ge.s32.totalorder %s2136_s15, 1  ;;  %p142_p8 = scmp.lt.s32.totalorder %s2136_s15, 4 }
   0xc   : > { %p143_p9 = pnand %p1922_p7, %p142_p8 }
   0xe   : > { %146 = sbr.rel (%p143_p9) target bundleno = 596 (0x254), region = 32 }
  0x13   : > { %v362_v0 = vld [vmem:[%s3883_s1 + $0x2d8] sm:$0xff]  ;;  %v361_v1 = vld [vmem:[%s3883_s1 + $0x2d0] sm:$0xff]  ;;  %v356_v2 = vld [vmem:[%s3883_s1 + $0x2a8] sm:$0xff]  ;;  %s167_s28 = smul.u32 48, %s2182_s16  ;;  %s164_s6 = sand.u32 1, %s2128_s13  }
  0x14   : > { %495 = vmatprep.subr.mxu0 %v362_v0  ;;  %1929 = vmatprep.subr.mxu1 %v362_v0  ;;  %v355_v3 = vld [vmem:[%s3883_s1 + $0x2a0] sm:$0xff]  ;;  %v350_v4 = vld [vmem:[%s3883_s1 + $0x278] sm:$0xff]  ;;  %v349_v5 = vld [vmem:[%s3883_s1 + $0x270] sm:$0xff]  ;;  %s3842_s20 = scalar_lea.sflag [#allocation3], %s164_s6  ;;  %s2138_s25 = smov [#allocation2]  }
  0x15   : > { %496 = vmatpush1.msra.mxu0 %v361_v1  ;;  %1961 = vmatpush1.msra.mxu1 %v361_v1  ;;  %v344_v6 = vld [vmem:[%s3883_s1 + $0x248] sm:$0xff]  ;;  %v343_v7 = vld [vmem:[%s3883_s1 + $0x240] sm:$0xff]  ;;  %v338_v8 = vld [vmem:[%s3883_s1 + $0x218] sm:$0xff]  ;;  %p168_p10 = scmp.lt.s32.totalorder %s167_s28, 143 }
  0x16   : > { %497 = vmatprep.subr.mxu0 %v356_v2  ;;  %1930 = vmatprep.subr.mxu1 %v356_v2  ;;  %v337_v9 = vld [vmem:[%s3883_s1 + $0x210] sm:$0xff]  ;;  %v332_v10 = vld [vmem:[%s3883_s1 + $0x1e8] sm:$0xff]  ;;  %v331_v11 = vld [vmem:[%s3883_s1 + $0x1e0] sm:$0xff] }
  0x17   : > { %498 = vmatpush1.msra.mxu0 %v355_v3  ;;  %1962 = vmatpush1.msra.mxu1 %v355_v3  ;;  %v326_v12 = vld [vmem:[%s3883_s1 + $0x1b8] sm:$0xff]  ;;  %v325_v13 = vld [vmem:[%s3883_s1 + $0x1b0] sm:$0xff]  ;;  %v320_v14 = vld [vmem:[%s3883_s1 + $0x188] sm:$0xff]  ;;  %s3897_s28 = smov (!%p168_p10, %s167_s28), 143 }
  0x18   : > { %499 = vmatprep.subr.mxu0 %v350_v4  ;;  %1931 = vmatprep.subr.mxu1 %v350_v4  ;;  %v319_v15 = vld [vmem:[%s3883_s1 + $0x180] sm:$0xff]  ;;  %v314_v16 = vld [vmem:[%s3883_s1 + $0x158] sm:$0xff]  ;;  %v313_v17 = vld [vmem:[%s3883_s1 + $0x150] sm:$0xff]  ;;  %s1928_s9 = sshll.u32 %s3897_s28, 4  ;;  %s2080_s28 = sshll.u32 %s2138_s25, 4  ;;  %s2081_s28 = int_to_ptr.vmem [resolvable:$false] %s2080_s28 }
  0x19   : > { %500 = vmatpush1.msra.mxu0 %v349_v5  ;;  %1963 = vmatpush1.msra.mxu1 %v349_v5  ;;  %v308_v18 = vld [vmem:[%s3883_s1 + $0x128] sm:$0xff]  ;;  %v307_v19 = vld [vmem:[%s3883_s1 + $0x120] sm:$0xff]  ;;  %v302_v20 = vld [vmem:[%s3883_s1 + $0xf8] sm:$0xff]  ;;  %s2399_s26 = scalar_lea.vmem %s3882_s0, %s1928_s9  ;;  %s1993_s9 = smul.u32 2304, %s164_s6 }
  0x1a   : > { %501 = vmatprep.subr.mxu0 %v344_v6  ;;  %1932 = vmatprep.subr.mxu1 %v344_v6  ;;  %v301_v21 = vld [vmem:[%s3883_s1 + $0xf0] sm:$0xff]  ;;  %v296_v22 = vld [vmem:[%s3883_s1 + $0xc8] sm:$0xff]  ;;  %v295_v23 = vld [vmem:[%s3883_s1 + $0xc0] sm:$0xff]  ;;  %s2082_s27 = scalar_lea.vmem %s2081_s28, 73728 }
  0x1b   : > { %502 = vmatpush1.msra.mxu0 %v343_v7  ;;  %1964 = vmatpush1.msra.mxu1 %v343_v7  ;;  %v290_v24 = vld [vmem:[%s3883_s1 + $0x98] sm:$0xff]  ;;  %v289_v25 = vld [vmem:[%s3883_s1 + $0x90] sm:$0xff]  ;;  %v284_v26 = vld [vmem:[%s3883_s1 + $0x68] sm:$0xff]  ;;  %s3170_s10 = scalar_lea.vmem [#allocation2], %s1993_s9 }
  0x1c   : > { %503 = vmatprep.subr.mxu0 %v338_v8  ;;  %1933 = vmatprep.subr.mxu1 %v338_v8  ;;  %v283_v27 = vld [vmem:[%s3883_s1 + $0x60] sm:$0xff]  ;;  %v278_v28 = vld [vmem:[%s3883_s1 + $0x38] sm:$0xff]  ;;  %v277_v29 = vld [vmem:[%s3883_s1 + $0x30] sm:$0xff]  ;;  %s1857_s11 = sshll.u32 %s3170_s10, 4  ;;  %s3832_s11 = int_to_ptr.vmem [resolvable:$true] %s1857_s11 }
  0x1d   : > { %504 = vmatpush1.msra.mxu0 %v337_v9  ;;  %1965 = vmatpush1.msra.mxu1 %v337_v9  ;;  %v272_v30 = vld [vmem:[%s3883_s1 + $0x8] sm:$0xff]  ;;  %v271_v31 = vld [vmem:[%s3883_s1] sm:$0xff]  ;;  %v458_v32 = vld [vmem:[%s3883_s1 + $0x5d8] sm:$0xff]  ;;  %s2076_s24 = scalar_lea.vmem %s3832_s11, 36864  ;;  %p2083_p0 = scmp.lt.s32.totalorder %s3832_s11, %s2081_s28 }
  0x1e   : > { %505 = vmatprep.subr.mxu0 %v332_v10  ;;  %1934 = vmatprep.subr.mxu1 %v332_v10  ;;  %v457_v33 = vld [vmem:[%s3883_s1 + $0x5d0] sm:$0xff]  ;;  %v452_v34 = vld [vmem:[%s3883_s1 + $0x5a8] sm:$0xff]  ;;  %v451_v35 = vld [vmem:[%s3883_s1 + $0x5a0] sm:$0xff]  ;;  %p2077_p11 = scmp.ne.s32.totalorder %s3832_s11, %s2076_s24  ;;  %p2084_p1 = scmp.lt.s32.totalorder %s2082_s27, %s2076_s24 }
  0x1f   : > { %506 = vmatpush1.msra.mxu0 %v331_v11  ;;  %1966 = vmatpush1.msra.mxu1 %v331_v11  ;;  %v446_v36 = vld [vmem:[%s3883_s1 + $0x578] sm:$0xff]  ;;  %v445_v37 = vld [vmem:[%s3883_s1 + $0x570] sm:$0xff]  ;;  %v440_v38 = vld [vmem:[%s3883_s1 + $0x548] sm:$0xff] }
  0x20   : > { %507 = vmatprep.subr.mxu0 %v326_v12  ;;  %1935 = vmatprep.subr.mxu1 %v326_v12  ;;  %v439_v39 = vld [vmem:[%s3883_s1 + $0x540] sm:$0xff]  ;;  %v434_v40 = vld [vmem:[%s3883_s1 + $0x518] sm:$0xff]  ;;  %v433_v41 = vld [vmem:[%s3883_s1 + $0x510] sm:$0xff]  ;;  %p2078_p12 = pnand %p2077_p11, %p2199_p5  ;;  %p2085_p2 = por %p2084_p1, %p2083_p0 }
  0x21   : > { %508 = vmatpush1.msra.mxu0 %v325_v13  ;;  %1967 = vmatpush1.msra.mxu1 %v325_v13  ;;  %v428_v42 = vld [vmem:[%s3883_s1 + $0x4e8] sm:$0xff]  ;;  %v427_v43 = vld [vmem:[%s3883_s1 + $0x4e0] sm:$0xff]  ;;  %v422_v44 = vld [vmem:[%s3883_s1 + $0x4b8] sm:$0xff] }
  0x22   : > { %509 = vmatprep.subr.mxu0 %v320_v14  ;;  %1936 = vmatprep.subr.mxu1 %v320_v14  ;;  %v421_v45 = vld [vmem:[%s3883_s1 + $0x4b0] sm:$0xff]  ;;  %v416_v46 = vld [vmem:[%s3883_s1 + $0x488] sm:$0xff]  ;;  %v415_v47 = vld [vmem:[%s3883_s1 + $0x480] sm:$0xff]  ;;  %p2079_p13 = pneg %p2078_p12 }
  0x23   : > { %510 = vmatpush1.msra.mxu0 %v319_v15  ;;  %1968 = vmatpush1.msra.mxu1 %v319_v15  ;;  %v410_v48 = vld [vmem:[%s3883_s1 + $0x458] sm:$0xff]  ;;  %v409_v49 = vld [vmem:[%s3883_s1 + $0x450] sm:$0xff]  ;;  %v404_v50 = vld [vmem:[%s3883_s1 + $0x428] sm:$0xff] }
  0x24   : > { %511 = vmatprep.subr.mxu0 %v314_v16  ;;  %1937 = vmatprep.subr.mxu1 %v314_v16  ;;  %v403_v51 = vld [vmem:[%s3883_s1 + $0x420] sm:$0xff]  ;;  %v398_v52 = vld [vmem:[%s3883_s1 + $0x3f8] sm:$0xff]  ;;  %v397_v53 = vld [vmem:[%s3883_s1 + $0x3f0] sm:$0xff]  ;;  %p2086_p3 = pnand %p2085_p2, %p2079_p13 }
  0x25   : > { %512 = vmatpush1.msra.mxu0 %v313_v17  ;;  %1969 = vmatpush1.msra.mxu1 %v313_v17  ;;  %v392_v54 = vld [vmem:[%s3883_s1 + $0x3c8] sm:$0xff]  ;;  %v391_v55 = vld [vmem:[%s3883_s1 + $0x3c0] sm:$0xff]  ;;  %v386_v56 = vld [vmem:[%s3883_s1 + $0x398] sm:$0xff] }
  0x26   : > { %513 = vmatprep.subr.mxu0 %v308_v18  ;;  %1938 = vmatprep.subr.mxu1 %v308_v18  ;;  %v385_v57 = vld [vmem:[%s3883_s1 + $0x390] sm:$0xff]  ;;  %v380_v58 = vld [vmem:[%s3883_s1 + $0x368] sm:$0xff]  ;;  %v379_v59 = vld [vmem:[%s3883_s1 + $0x360] sm:$0xff] }
  0x27   : > { %514 = vmatpush1.msra.mxu0 %v307_v19  ;;  %1970 = vmatpush1.msra.mxu1 %v307_v19  ;;  %v374_v60 = vld [vmem:[%s3883_s1 + $0x338] sm:$0xff]  ;;  %v373_v61 = vld [vmem:[%s3883_s1 + $0x330] sm:$0xff]  ;;  %v368_v62 = vld [vmem:[%s3883_s1 + $0x308] sm:$0xff] }
  0x28   : > { %515 = vmatprep.subr.mxu0 %v302_v20  ;;  %1939 = vmatprep.subr.mxu1 %v302_v20  ;;  %v367_v63 = vld [vmem:[%s3883_s1 + $0x300] sm:$0xff]  ;;  %v2408_v0 = vld [vmem:[%s2399_s26 + $0x8] sm:$0xff]  ;;  %v366_v5 = vld [vmem:[%s3883_s1 + $0x2f8] sm:$0xff] }
  0x29   : > { %516 = vmatpush1.msra.mxu0 %v301_v21  ;;  %1971 = vmatpush1.msra.mxu1 %v301_v21  ;;  %v224_v1 = vld [vmem:[%s2399_s26 + $0x188] sm:$0xff]  ;;  %v2412_v2 = vld [vmem:[%s2399_s26] sm:$0xff]  ;;  %v365_v7 = vld [vmem:[%s3883_s1 + $0x2f0] sm:$0xff] }
  0x2a   : > { %517 = vmatprep.subr.mxu0 %v296_v22  ;;  %1940 = vmatprep.subr.mxu1 %v296_v22  ;;  %v223_v3 = vld [vmem:[%s2399_s26 + $0x180] sm:$0xff]  ;;  %v364_v4 = vld [vmem:[%s3883_s1 + $0x2e8] sm:$0xff]  ;;  %v2430_v8 = vld [vmem:[%s2399_s26 + $0x18] sm:$0xff] }
  0x2b   : > { %518 = vmatpush1.msra.mxu0 %v295_v23  ;;  %1972 = vmatpush1.msra.mxu1 %v295_v23  ;;  %v363_v6 = vld [vmem:[%s3883_s1 + $0x2e0] sm:$0xff]  ;;  %v226_v9 = vld [vmem:[%s2399_s26 + $0x198] sm:$0xff]  ;;  %v360_v11 = vld [vmem:[%s3883_s1 + $0x2c8] sm:$0xff] }
  0x2c   : > { %519 = vmatprep.subr.mxu0 %v290_v24  ;;  %1941 = vmatprep.subr.mxu1 %v290_v24  ;;  %v358_v10 = vld [vmem:[%s3883_s1 + $0x2b8] sm:$0xff]  ;;  %v2440_v12 = vld [vmem:[%s2399_s26 + $0x10] sm:$0xff]  ;;  %v359_v15 = vld [vmem:[%s3883_s1 + $0x2c0] sm:$0xff] }
  0x2d   : > { %520 = vmatpush1.msra.mxu0 %v289_v25  ;;  %1973 = vmatpush1.msra.mxu1 %v289_v25  ;;  %v225_v13 = vld [vmem:[%s2399_s26 + $0x190] sm:$0xff]  ;;  %v352_v16 = vld [vmem:[%s3883_s1 + $0x288] sm:$0xff]  ;;  %v354_v17 = vld [vmem:[%s3883_s1 + $0x298] sm:$0xff] }
  0x2e   : > { %521 = vmatprep.subr.mxu0 %v284_v26  ;;  %1942 = vmatprep.subr.mxu1 %v284_v26  ;;  %v357_v14 = vld [vmem:[%s3883_s1 + $0x2b0] sm:$0xff]  ;;  %v2458_v18 = vld [vmem:[%s2399_s26 + $0x28] sm:$0xff]  ;;  %v351_v20 = vld [vmem:[%s3883_s1 + $0x280] sm:$0xff] }
  0x2f   : > { %522 = vmatpush1.msra.mxu0 %v283_v27  ;;  %1974 = vmatpush1.msra.mxu1 %v283_v27  ;;  %v228_v19 = vld [vmem:[%s2399_s26 + $0x1a8] sm:$0xff]  ;;  %v353_v21 = vld [vmem:[%s3883_s1 + $0x290] sm:$0xff]  ;;  %v2468_v22 = vld [vmem:[%s2399_s26 + $0x20] sm:$0xff] }
  0x30   : > { %523 = vmatprep.subr.mxu0 %v278_v28  ;;  %1943 = vmatprep.subr.mxu1 %v278_v28  ;;  %v227_v23 = vld [vmem:[%s2399_s26 + $0x1a0] sm:$0xff]  ;;  %v346_v24 = vld [vmem:[%s3883_s1 + $0x258] sm:$0xff]  ;;  %v348_v25 = vld [vmem:[%s3883_s1 + $0x268] sm:$0xff] }
  0x31   : > { %524 = vmatpush1.msra.mxu0 %v277_v29  ;;  %1975 = vmatpush1.msra.mxu1 %v277_v29  ;;  %v345_v26 = vld [vmem:[%s3883_s1 + $0x250] sm:$0xff]  ;;  %v347_v27 = vld [vmem:[%s3883_s1 + $0x260] sm:$0xff]  ;;  %v2486_v28 = vld [vmem:[%s2399_s26 + $0x38] sm:$0xff] }
  0x32   : > { %525 = vmatprep.subr.mxu0 %v272_v30  ;;  %1944 = vmatprep.subr.mxu1 %v272_v30  ;;  %v230_v29 = vld [vmem:[%s2399_s26 + $0x1b8] sm:$0xff]  ;;  %v2490_v30 = vld [vmem:[%s2399_s26 + $0x30] sm:$0xff] }
  0x33   : > { %526 = vmatpush1.msra.mxu0 %v271_v31  ;;  %1976 = vmatpush1.msra.mxu1 %v271_v31  ;;  %v229_v31 = vld [vmem:[%s2399_s26 + $0x1b0] sm:$0xff] }
  0x34   : > { %527 = vmatprep.subr.mxu0 %v458_v32  ;;  %1945 = vmatprep.subr.mxu1 %v458_v32  ;;  %v340_v32 = vld [vmem:[%s3883_s1 + $0x228] sm:$0xff] }
  0x35   : > { %528 = vmatpush2.msra.mxu0 %v457_v33  ;;  %1977 = vmatpush2.msra.mxu1 %v457_v33  ;;  %v342_v33 = vld [vmem:[%s3883_s1 + $0x238] sm:$0xff] }
  0x36   : > { %529 = vmatprep.subr.mxu0 %v452_v34  ;;  %1946 = vmatprep.subr.mxu1 %v452_v34  ;;  %v339_v34 = vld [vmem:[%s3883_s1 + $0x220] sm:$0xff] }
  0x37   : > { %530 = vmatpush2.msra.mxu0 %v451_v35  ;;  %1978 = vmatpush2.msra.mxu1 %v451_v35  ;;  %v341_v35 = vld [vmem:[%s3883_s1 + $0x230] sm:$0xff] }
  0x38   : > { %531 = vmatprep.subr.mxu0 %v446_v36  ;;  %1947 = vmatprep.subr.mxu1 %v446_v36  ;;  %v2508_v36 = vld [vmem:[%s2399_s26 + $0x48] sm:$0xff] }
  0x39   : > { %532 = vmatpush2.msra.mxu0 %v445_v37  ;;  %1979 = vmatpush2.msra.mxu1 %v445_v37  ;;  %v232_v37 = vld [vmem:[%s2399_s26 + $0x1c8] sm:$0xff] }
  0x3a   : > { %533 = vmatprep.subr.mxu0 %v440_v38  ;;  %1948 = vmatprep.subr.mxu1 %v440_v38  ;;  %v334_v38 = vld [vmem:[%s3883_s1 + $0x1f8] sm:$0xff] }
  0x3b   : > { %534 = vmatpush2.msra.mxu0 %v439_v39  ;;  %1980 = vmatpush2.msra.mxu1 %v439_v39  ;;  %v336_v39 = vld [vmem:[%s3883_s1 + $0x208] sm:$0xff] }
  0x3c   : > { %535 = vmatprep.subr.mxu0 %v434_v40  ;;  %1949 = vmatprep.subr.mxu1 %v434_v40  ;;  %v2518_v40 = vld [vmem:[%s2399_s26 + $0x40] sm:$0xff] }
  0x3d   : > { %536 = vmatpush2.msra.mxu0 %v433_v41  ;;  %1981 = vmatpush2.msra.mxu1 %v433_v41  ;;  %v231_v41 = vld [vmem:[%s2399_s26 + $0x1c0] sm:$0xff] }
  0x3e   : > { %537 = vmatprep.subr.mxu0 %v428_v42  ;;  %1950 = vmatprep.subr.mxu1 %v428_v42  ;;  %v333_v42 = vld [vmem:[%s3883_s1 + $0x1f0] sm:$0xff] }
  0x3f   : > { %538 = vmatpush2.msra.mxu0 %v427_v43  ;;  %1982 = vmatpush2.msra.mxu1 %v427_v43  ;;  %v335_v43 = vld [vmem:[%s3883_s1 + $0x200] sm:$0xff] }
  0x40   : > { %539 = vmatprep.subr.mxu0 %v422_v44  ;;  %1951 = vmatprep.subr.mxu1 %v422_v44  ;;  %v328_v44 = vld [vmem:[%s3883_s1 + $0x1c8] sm:$0xff] }
  0x41   : > { %540 = vmatpush2.msra.mxu0 %v421_v45  ;;  %1983 = vmatpush2.msra.mxu1 %v421_v45  ;;  %v330_v45 = vld [vmem:[%s3883_s1 + $0x1d8] sm:$0xff] }
  0x42   : > { %541 = vmatprep.subr.mxu0 %v416_v46  ;;  %1952 = vmatprep.subr.mxu1 %v416_v46  ;;  %v2536_v46 = vld [vmem:[%s2399_s26 + $0x58] sm:$0xff] }
  0x43   : > { %542 = vmatpush2.msra.mxu0 %v415_v47  ;;  %1984 = vmatpush2.msra.mxu1 %v415_v47  ;;  %v234_v47 = vld [vmem:[%s2399_s26 + $0x1d8] sm:$0xff] }
  0x44   : > { %543 = vmatprep.subr.mxu0 %v410_v48  ;;  %1953 = vmatprep.subr.mxu1 %v410_v48  ;;  %v327_v48 = vld [vmem:[%s3883_s1 + $0x1c0] sm:$0xff] }
  0x45   : > { %544 = vmatpush2.msra.mxu0 %v409_v49  ;;  %1985 = vmatpush2.msra.mxu1 %v409_v49  ;;  %v329_v49 = vld [vmem:[%s3883_s1 + $0x1d0] sm:$0xff] }
  0x46   : > { %545 = vmatprep.subr.mxu0 %v404_v50  ;;  %1954 = vmatprep.subr.mxu1 %v404_v50  ;;  %v2546_v50 = vld [vmem:[%s2399_s26 + $0x50] sm:$0xff] }
  0x47   : > { %546 = vmatpush2.msra.mxu0 %v403_v51  ;;  %1986 = vmatpush2.msra.mxu1 %v403_v51  ;;  %v233_v51 = vld [vmem:[%s2399_s26 + $0x1d0] sm:$0xff] }
  0x48   : > { %547 = vmatprep.subr.mxu0 %v398_v52  ;;  %1955 = vmatprep.subr.mxu1 %v398_v52  ;;  %v322_v52 = vld [vmem:[%s3883_s1 + $0x198] sm:$0xff] }
  0x49   : > { %548 = vmatpush2.msra.mxu0 %v397_v53  ;;  %1987 = vmatpush2.msra.mxu1 %v397_v53  ;;  %v324_v53 = vld [vmem:[%s3883_s1 + $0x1a8] sm:$0xff] }
  0x4a   : > { %549 = vmatprep.subr.mxu0 %v392_v54  ;;  %1956 = vmatprep.subr.mxu1 %v392_v54  ;;  %v321_v54 = vld [vmem:[%s3883_s1 + $0x190] sm:$0xff] }
  0x4b   : > { %550 = vmatpush2.msra.mxu0 %v391_v55  ;;  %1988 = vmatpush2.msra.mxu1 %v391_v55  ;;  %v323_v55 = vld [vmem:[%s3883_s1 + $0x1a0] sm:$0xff] }
  0x4c   : > { %551 = vmatprep.subr.mxu0 %v386_v56  ;;  %1957 = vmatprep.subr.mxu1 %v386_v56  ;;  %v2564_v56 = vld [vmem:[%s2399_s26 + $0x68] sm:$0xff] }
  0x4d   : > { %552 = vmatpush2.msra.mxu0 %v385_v57  ;;  %1989 = vmatpush2.msra.mxu1 %v385_v57  ;;  %v236_v57 = vld [vmem:[%s2399_s26 + $0x1e8] sm:$0xff] }
  0x4e   : > { %553 = vmatprep.subr.mxu0 %v380_v58  ;;  %1958 = vmatprep.subr.mxu1 %v380_v58  ;;  %v2568_v58 = vld [vmem:[%s2399_s26 + $0x60] sm:$0xff] }
  0x4f   : > { %554 = vmatpush2.msra.mxu0 %v379_v59  ;;  %1990 = vmatpush2.msra.mxu1 %v379_v59  ;;  %v235_v59 = vld [vmem:[%s2399_s26 + $0x1e0] sm:$0xff] }
  0x50   : > { %555 = vmatprep.subr.mxu0 %v374_v60  ;;  %1959 = vmatprep.subr.mxu1 %v374_v60  ;;  %v316_v60 = vld [vmem:[%s3883_s1 + $0x168] sm:$0xff] }
  0x51   : > { %556 = vmatpush2.msra.mxu0 %v373_v61  ;;  %1991 = vmatpush2.msra.mxu1 %v373_v61  ;;  %v318_v61 = vld [vmem:[%s3883_s1 + $0x178] sm:$0xff] }
  0x52   : > { %557 = vmatprep.subr.mxu0 %v368_v62  ;;  %1960 = vmatprep.subr.mxu1 %v368_v62  ;;  %v315_v62 = vld [vmem:[%s3883_s1 + $0x160] sm:$0xff] }
  0x53   : > { %558 = vmatpush2.msra.mxu0 %v367_v63  ;;  %1992 = vmatpush2.msra.mxu1 %v367_v63  ;;  %v317_v63 = vld [vmem:[%s3883_s1 + $0x170] sm:$0xff] }
  0x54   : > { %559 = vmatprep.mubr.f32.mxu0 %v2408_v0  ;;  %703 = vmatprep.mubr.f32.mxu1 %v224_v1  ;;  %v2586_v1 = vld [vmem:[%s2399_s26 + $0x78] sm:$0xff] }
  0x55   : > { %560 = vmatmul.mubr.f32.vlgmr.msra.gmra.mxu0 %v2412_v2  ;;  %704 = vmatmul.mubr.f32.vlgmr.msra.gmra.mxu1 %v223_v3  ;;  %v238_v3 = vld [vmem:[%s2399_s26 + $0x1f8] sm:$0xff] }
  0x56   : > { %848 = vmatprep.subr.mxu1 %v364_v4  ;;  %1201 = vmatprep.subr.mxu0 %v366_v5  ;;  %v310_v4 = vld [vmem:[%s3883_s1 + $0x138] sm:$0xff]  ;;  %v312_v5 = vld [vmem:[%s3883_s1 + $0x148] sm:$0xff] }
  0x57   : > { %849 = vmatpush1.msra.mxu1 %v363_v6  ;;  %1202 = vmatpush1.msra.mxu0 %v365_v7  ;;  %v2596_v6 = vld [vmem:[%s2399_s26 + $0x70] sm:$0xff] }
  0x58   : > { %565 = vmatprep.mubr.f32.mxu0 %v2430_v8  ;;  %709 = vmatprep.mubr.f32.mxu1 %v226_v9  ;;  %v237_v7 = vld [vmem:[%s2399_s26 + $0x1f0] sm:$0xff] }
  0x59   : > { %850 = vmatprep.subr.mxu1 %v358_v10  ;;  %1203 = vmatprep.subr.mxu0 %v360_v11  ;;  %v309_v9 = vld [vmem:[%s3883_s1 + $0x130] sm:$0xff]  ;;  %v311_v10 = vld [vmem:[%s3883_s1 + $0x140] sm:$0xff]  ;;  %v304_v11 = vld [vmem:[%s3883_s1 + $0x108] sm:$0xff] }
  0x5a   : > { %566 = vmatmul.mubr.f32.gmra.mxu0 %v2440_v12  ;;  %710 = vmatmul.mubr.f32.gmra.mxu1 %v225_v13  ;;  %v306_v13 = vld [vmem:[%s3883_s1 + $0x118] sm:$0xff] }
  0x5b   : > { %851 = vmatpush1.msra.mxu1 %v357_v14  ;;  %1204 = vmatpush1.msra.mxu0 %v359_v15  ;;  %v2614_v14 = vld [vmem:[%s2399_s26 + $0x88] sm:$0xff] }
  0x5c   : > { %852 = vmatprep.subr.mxu1 %v352_v16  ;;  %1205 = vmatprep.subr.mxu0 %v354_v17  ;;  %v240_v15 = vld [vmem:[%s2399_s26 + $0x208] sm:$0xff]  ;;  %v303_v16 = vld [vmem:[%s3883_s1 + $0x100] sm:$0xff]  ;;  %v305_v17 = vld [vmem:[%s3883_s1 + $0x110] sm:$0xff] }
  0x5d   : > { %571 = vmatprep.mubr.f32.mxu0 %v2458_v18  ;;  %715 = vmatprep.mubr.f32.mxu1 %v228_v19  ;;  %v2624_v19 = vld [vmem:[%s2399_s26 + $0x80] sm:$0xff] }
  0x5e   : > { %853 = vmatpush1.msra.mxu1 %v351_v20  ;;  %1206 = vmatpush1.msra.mxu0 %v353_v21  ;;  %v239_v20 = vld [vmem:[%s2399_s26 + $0x200] sm:$0xff]  ;;  %v298_v21 = vld [vmem:[%s3883_s1 + $0xd8] sm:$0xff] }
  0x5f   : > { %572 = vmatmul.mubr.f32.gmra.mxu0 %v2468_v22  ;;  %716 = vmatmul.mubr.f32.gmra.mxu1 %v227_v23  ;;  %v300_v23 = vld [vmem:[%s3883_s1 + $0xe8] sm:$0xff] }
  0x60   : > { %854 = vmatprep.subr.mxu1 %v346_v24  ;;  %1207 = vmatprep.subr.mxu0 %v348_v25  ;;  %v297_v24 = vld [vmem:[%s3883_s1 + $0xd0] sm:$0xff]  ;;  %v299_v25 = vld [vmem:[%s3883_s1 + $0xe0] sm:$0xff] }
  0x61   : > { %855 = vmatpush1.msra.mxu1 %v345_v26  ;;  %1208 = vmatpush1.msra.mxu0 %v347_v27  ;;  %v2642_v26 = vld [vmem:[%s2399_s26 + $0x98] sm:$0xff] }
  0x62   : > { %577 = vmatprep.mubr.f32.mxu0 %v2486_v28  ;;  %721 = vmatprep.mubr.f32.mxu1 %v230_v29  ;;  %v242_v27 = vld [vmem:[%s2399_s26 + $0x218] sm:$0xff]  ;;  %v2646_v29 = vld [vmem:[%s2399_s26 + $0x90] sm:$0xff] }
  0x63   : > { %578 = vmatmul.mubr.f32.gmra.mxu0 %v2490_v30  ;;  %722 = vmatmul.mubr.f32.gmra.mxu1 %v229_v31  ;;  %v241_v31 = vld [vmem:[%s2399_s26 + $0x210] sm:$0xff] }
  0x64   : > { %856 = vmatprep.subr.mxu1 %v340_v32  ;;  %1209 = vmatprep.subr.mxu0 %v342_v33  ;;  %v292_v32 = vld [vmem:[%s3883_s1 + $0xa8] sm:$0xff]  ;;  %v294_v33 = vld [vmem:[%s3883_s1 + $0xb8] sm:$0xff] }
  0x65   : > { %857 = vmatpush1.msra.mxu1 %v339_v34  ;;  %1210 = vmatpush1.msra.mxu0 %v341_v35  ;;  %v291_v34 = vld [vmem:[%s3883_s1 + $0xa0] sm:$0xff]  ;;  %v293_v35 = vld [vmem:[%s3883_s1 + $0xb0] sm:$0xff] }
  0x66   : > { %583 = vmatprep.mubr.f32.mxu0 %v2508_v36  ;;  %727 = vmatprep.mubr.f32.mxu1 %v232_v37  ;;  %v2664_v37 = vld [vmem:[%s2399_s26 + $0xa8] sm:$0xff] }
  0x67   : > { %858 = vmatprep.subr.mxu1 %v334_v38  ;;  %1211 = vmatprep.subr.mxu0 %v336_v39  ;;  %v244_v38 = vld [vmem:[%s2399_s26 + $0x228] sm:$0xff]  ;;  %v286_v39 = vld [vmem:[%s3883_s1 + $0x78] sm:$0xff] }
  0x68   : > { %584 = vmatmul.mubr.f32.gmra.mxu0 %v2518_v40  ;;  %728 = vmatmul.mubr.f32.gmra.mxu1 %v231_v41  ;;  %v288_v41 = vld [vmem:[%s3883_s1 + $0x88] sm:$0xff] }
  0x69   : > { %859 = vmatpush1.msra.mxu1 %v333_v42  ;;  %1212 = vmatpush1.msra.mxu0 %v335_v43  ;;  %v2674_v42 = vld [vmem:[%s2399_s26 + $0xa0] sm:$0xff] }
  0x6a   : > { %860 = vmatprep.subr.mxu1 %v328_v44  ;;  %1213 = vmatprep.subr.mxu0 %v330_v45  ;;  %v243_v43 = vld [vmem:[%s2399_s26 + $0x220] sm:$0xff]  ;;  %v285_v44 = vld [vmem:[%s3883_s1 + $0x70] sm:$0xff] }
  0x6b   : > { %589 = vmatprep.mubr.f32.mxu0 %v2536_v46  ;;  %733 = vmatprep.mubr.f32.mxu1 %v234_v47  ;;  %v287_v45 = vld [vmem:[%s3883_s1 + $0x80] sm:$0xff]  ;;  %v280_v47 = vld [vmem:[%s3883_s1 + $0x48] sm:$0xff] }
  0x6c   : > { %861 = vmatpush1.msra.mxu1 %v327_v48  ;;  %1214 = vmatpush1.msra.mxu0 %v329_v49  ;;  %v282_v48 = vld [vmem:[%s3883_s1 + $0x58] sm:$0xff] }
  0x6d   : > { %590 = vmatmul.mubr.f32.gmra.mxu0 %v2546_v50  ;;  %734 = vmatmul.mubr.f32.gmra.mxu1 %v233_v51  ;;  %v2692_v49 = vld [vmem:[%s2399_s26 + $0xb8] sm:$0xff] }
  0x6e   : > { %862 = vmatprep.subr.mxu1 %v322_v52  ;;  %1215 = vmatprep.subr.mxu0 %v324_v53  ;;  %v246_v51 = vld [vmem:[%s2399_s26 + $0x238] sm:$0xff]  ;;  %v279_v52 = vld [vmem:[%s3883_s1 + $0x40] sm:$0xff]  ;;  %v281_v53 = vld [vmem:[%s3883_s1 + $0x50] sm:$0xff] }
  0x6f   : > { %863 = vmatpush1.msra.mxu1 %v321_v54  ;;  %1216 = vmatpush1.msra.mxu0 %v323_v55  ;;  %v2702_v54 = vld [vmem:[%s2399_s26 + $0xb0] sm:$0xff] }
  0x70   : > { %595 = vmatprep.mubr.f32.mxu0 %v2564_v56  ;;  %739 = vmatprep.mubr.f32.mxu1 %v236_v57  ;;  %v245_v55 = vld [vmem:[%s2399_s26 + $0x230] sm:$0xff]  ;;  %v274_v57 = vld [vmem:[%s3883_s1 + $0x18] sm:$0xff] }
  0x71   : > { %596 = vmatmul.mubr.f32.gmra.mxu0 %v2568_v58  ;;  %740 = vmatmul.mubr.f32.gmra.mxu1 %v235_v59  ;;  %v276_v59 = vld [vmem:[%s3883_s1 + $0x28] sm:$0xff] }
  0x72   : > { %864 = vmatprep.subr.mxu1 %v316_v60  ;;  %1217 = vmatprep.subr.mxu0 %v318_v61  ;;  %v273_v60 = vld [vmem:[%s3883_s1 + $0x10] sm:$0xff]  ;;  %v275_v61 = vld [vmem:[%s3883_s1 + $0x20] sm:$0xff] }
  0x73   : > { %865 = vmatpush1.msra.mxu1 %v315_v62  ;;  %1218 = vmatpush1.msra.mxu0 %v317_v63  ;;  %v2720_v62 = vld [vmem:[%s2399_s26 + $0xc8] sm:$0xff] }
  0x74   : > { %601 = vmatprep.mubr.f32.mxu0 %v2586_v1  ;;  %745 = vmatprep.mubr.f32.mxu1 %v238_v3  ;;  %v248_v63 = vld [vmem:[%s2399_s26 + $0x248] sm:$0xff]  ;;  %v2724_v3 = vld [vmem:[%s2399_s26 + $0xc0] sm:$0xff] }
  0x75   : > { %866 = vmatprep.subr.mxu1 %v310_v4  ;;  %1219 = vmatprep.subr.mxu0 %v312_v5  ;;  %v247_v4 = vld [vmem:[%s2399_s26 + $0x240] sm:$0xff]  ;;  %v460_v5 = vld [vmem:[%s3883_s1 + $0x5e8] sm:$0xff] }
  0x76   : > { %602 = vmatmul.mubr.f32.gmra.mxu0 %v2596_v6  ;;  %746 = vmatmul.mubr.f32.gmra.mxu1 %v237_v7  ;;  %v462_v7 = vld [vmem:[%s3883_s1 + $0x5f8] sm:$0xff] }
  0x77   : > { %867 = vmatpush1.msra.mxu1 %v309_v9  ;;  %1220 = vmatpush1.msra.mxu0 %v311_v10  ;;  %v459_v9 = vld [vmem:[%s3883_s1 + $0x5e0] sm:$0xff]  ;;  %v461_v10 = vld [vmem:[%s3883_s1 + $0x5f0] sm:$0xff] }
  0x78   : > { %868 = vmatprep.subr.mxu1 %v304_v11  ;;  %1221 = vmatprep.subr.mxu0 %v306_v13  ;;  %v2742_v11 = vld [vmem:[%s2399_s26 + $0xd8] sm:$0xff] }
  0x79   : > { %607 = vmatprep.mubr.f32.mxu0 %v2614_v14  ;;  %751 = vmatprep.mubr.f32.mxu1 %v240_v15  ;;  %v250_v13 = vld [vmem:[%s2399_s26 + $0x258] sm:$0xff] }
  0x7a   : > { %869 = vmatpush1.msra.mxu1 %v303_v16  ;;  %1222 = vmatpush1.msra.mxu0 %v305_v17  ;;  %v454_v15 = vld [vmem:[%s3883_s1 + $0x5b8] sm:$0xff]  ;;  %v456_v16 = vld [vmem:[%s3883_s1 + $0x5c8] sm:$0xff]  ;;  %v2752_v17 = vld [vmem:[%s2399_s26 + $0xd0] sm:$0xff] }
  0x7b   : > { %608 = vmatmul.mubr.f32.gmra.mxu0 %v2624_v19  ;;  %752 = vmatmul.mubr.f32.gmra.mxu1 %v239_v20  ;;  %v249_v20 = vld [vmem:[%s2399_s26 + $0x250] sm:$0xff] }
  0x7c   : > { %870 = vmatprep.subr.mxu1 %v298_v21  ;;  %1223 = vmatprep.subr.mxu0 %v300_v23  ;;  %v453_v21 = vld [vmem:[%s3883_s1 + $0x5b0] sm:$0xff]  ;;  %v455_v23 = vld [vmem:[%s3883_s1 + $0x5c0] sm:$0xff] }
  0x7d   : > { %871 = vmatpush1.msra.mxu1 %v297_v24  ;;  %1224 = vmatpush1.msra.mxu0 %v299_v25  ;;  %v448_v24 = vld [vmem:[%s3883_s1 + $0x588] sm:$0xff]  ;;  %v450_v25 = vld [vmem:[%s3883_s1 + $0x598] sm:$0xff] }
  0x7e   : > { %613 = vmatprep.mubr.f32.mxu0 %v2642_v26  ;;  %757 = vmatprep.mubr.f32.mxu1 %v242_v27  ;;  %v2770_v27 = vld [vmem:[%s2399_s26 + $0xe8] sm:$0xff] }
  0x7f   : > { %614 = vmatmul.mubr.f32.gmra.mxu0 %v2646_v29  ;;  %758 = vmatmul.mubr.f32.gmra.mxu1 %v241_v31  ;;  %v252_v31 = vld [vmem:[%s2399_s26 + $0x268] sm:$0xff] }
  0x80   : > { %872 = vmatprep.subr.mxu1 %v292_v32  ;;  %1225 = vmatprep.subr.mxu0 %v294_v33  ;;  %v447_v32 = vld [vmem:[%s3883_s1 + $0x580] sm:$0xff]  ;;  %v449_v33 = vld [vmem:[%s3883_s1 + $0x590] sm:$0xff] }
  0x81   : > { %873 = vmatpush1.msra.mxu1 %v291_v34  ;;  %1226 = vmatpush1.msra.mxu0 %v293_v35  ;;  %v2780_v34 = vld [vmem:[%s2399_s26 + $0xe0] sm:$0xff] }
  0x82   : > { %619 = vmatprep.mubr.f32.mxu0 %v2664_v37  ;;  %763 = vmatprep.mubr.f32.mxu1 %v244_v38  ;;  %v251_v35 = vld [vmem:[%s2399_s26 + $0x260] sm:$0xff]  ;;  %v442_v38 = vld [vmem:[%s3883_s1 + $0x558] sm:$0xff] }
  0x83   : > { %874 = vmatprep.subr.mxu1 %v286_v39  ;;  %1227 = vmatprep.subr.mxu0 %v288_v41  ;;  %v444_v39 = vld [vmem:[%s3883_s1 + $0x568] sm:$0xff]  ;;  %v441_v41 = vld [vmem:[%s3883_s1 + $0x550] sm:$0xff] }
  0x84   : > { %620 = vmatmul.mubr.f32.gmra.mxu0 %v2674_v42  ;;  %764 = vmatmul.mubr.f32.gmra.mxu1 %v243_v43  ;;  %v443_v43 = vld [vmem:[%s3883_s1 + $0x560] sm:$0xff] }
  0x85   : > { %875 = vmatpush1.msra.mxu1 %v285_v44  ;;  %1228 = vmatpush1.msra.mxu0 %v287_v45  ;;  %v2798_v44 = vld [vmem:[%s2399_s26 + $0xf8] sm:$0xff] }
  0x86   : > { %876 = vmatprep.subr.mxu1 %v280_v47  ;;  %1229 = vmatprep.subr.mxu0 %v282_v48  ;;  %v254_v45 = vld [vmem:[%s2399_s26 + $0x278] sm:$0xff]  ;;  %v2802_v47 = vld [vmem:[%s2399_s26 + $0xf0] sm:$0xff] }
  0x87   : > { %625 = vmatprep.mubr.f32.mxu0 %v2692_v49  ;;  %769 = vmatprep.mubr.f32.mxu1 %v246_v51  ;;  %v253_v48 = vld [vmem:[%s2399_s26 + $0x270] sm:$0xff]  ;;  %v436_v51 = vld [vmem:[%s3883_s1 + $0x528] sm:$0xff] }
  0x88   : > { %877 = vmatpush1.msra.mxu1 %v279_v52  ;;  %1230 = vmatpush1.msra.mxu0 %v281_v53  ;;  %v438_v52 = vld [vmem:[%s3883_s1 + $0x538] sm:$0xff]  ;;  %v435_v53 = vld [vmem:[%s3883_s1 + $0x520] sm:$0xff] }
  0x89   : > { %626 = vmatmul.mubr.f32.gmra.mxu0 %v2702_v54  ;;  %770 = vmatmul.mubr.f32.gmra.mxu1 %v245_v55  ;;  %v437_v55 = vld [vmem:[%s3883_s1 + $0x530] sm:$0xff] }
  0x8a   : > { %878 = vmatprep.subr.mxu1 %v274_v57  ;;  %1231 = vmatprep.subr.mxu0 %v276_v59  ;;  %v2820_v57 = vld [vmem:[%s2399_s26 + $0x108] sm:$0xff] }
  0x8b   : > { %879 = vmatpush1.msra.mxu1 %v273_v60  ;;  %1232 = vmatpush1.msra.mxu0 %v275_v61  ;;  %v256_v59 = vld [vmem:[%s2399_s26 + $0x288] sm:$0xff]  ;;  %v430_v60 = vld [vmem:[%s3883_s1 + $0x4f8] sm:$0xff] }
  0x8c   : > { %631 = vmatprep.mubr.f32.mxu0 %v2720_v62  ;;  %775 = vmatprep.mubr.f32.mxu1 %v248_v63  ;;  %v432_v61 = vld [vmem:[%s3883_s1 + $0x508] sm:$0xff]  ;;  %v2830_v63 = vld [vmem:[%s2399_s26 + $0x100] sm:$0xff] }
  0x8d   : > { %632 = vmatmul.mubr.f32.gmra.mxu0 %v2724_v3  ;;  %776 = vmatmul.mubr.f32.gmra.mxu1 %v247_v4  ;;  %v255_v4 = vld [vmem:[%s2399_s26 + $0x280] sm:$0xff] }
  0x8e   : > { %880 = vmatprep.subr.mxu1 %v460_v5  ;;  %1233 = vmatprep.subr.mxu0 %v462_v7  ;;  %v429_v5 = vld [vmem:[%s3883_s1 + $0x4f0] sm:$0xff]  ;;  %v431_v7 = vld [vmem:[%s3883_s1 + $0x500] sm:$0xff] }
  0x8f   : > { %881 = vmatpush2.msra.mxu1 %v459_v9  ;;  %1234 = vmatpush2.msra.mxu0 %v461_v10  ;;  %v424_v9 = vld [vmem:[%s3883_s1 + $0x4c8] sm:$0xff]  ;;  %v426_v10 = vld [vmem:[%s3883_s1 + $0x4d8] sm:$0xff] }
  0x90   : > { %637 = vmatprep.mubr.f32.mxu0 %v2742_v11  ;;  %781 = vmatprep.mubr.f32.mxu1 %v250_v13  ;;  %v2848_v13 = vld [vmem:[%s2399_s26 + $0x118] sm:$0xff] }
  0x91   : > { %882 = vmatprep.subr.mxu1 %v454_v15  ;;  %1235 = vmatprep.subr.mxu0 %v456_v16  ;;  %v258_v15 = vld [vmem:[%s2399_s26 + $0x298] sm:$0xff]  ;;  %v423_v16 = vld [vmem:[%s3883_s1 + $0x4c0] sm:$0xff] }
  0x92   : > { %638 = vmatmul.mubr.f32.gmra.mxu0 %v2752_v17  ;;  %782 = vmatmul.mubr.f32.gmra.mxu1 %v249_v20  ;;  %v425_v20 = vld [vmem:[%s3883_s1 + $0x4d0] sm:$0xff] }
  0x93   : > { %883 = vmatpush2.msra.mxu1 %v453_v21  ;;  %1236 = vmatpush2.msra.mxu0 %v455_v23  ;;  %v2858_v21 = vld [vmem:[%s2399_s26 + $0x110] sm:$0xff] }
  0x94   : > { %884 = vmatprep.subr.mxu1 %v448_v24  ;;  %1237 = vmatprep.subr.mxu0 %v450_v25  ;;  %v257_v23 = vld [vmem:[%s2399_s26 + $0x290] sm:$0xff]  ;;  %v418_v24 = vld [vmem:[%s3883_s1 + $0x498] sm:$0xff]  ;;  %v420_v25 = vld [vmem:[%s3883_s1 + $0x4a8] sm:$0xff] }
  0x95   : > { %643 = vmatprep.mubr.f32.mxu0 %v2770_v27  ;;  %787 = vmatprep.mubr.f32.mxu1 %v252_v31  ;;  %v417_v31 = vld [vmem:[%s3883_s1 + $0x490] sm:$0xff] }
  0x96   : > { %885 = vmatpush2.msra.mxu1 %v447_v32  ;;  %1238 = vmatpush2.msra.mxu0 %v449_v33  ;;  %v419_v32 = vld [vmem:[%s3883_s1 + $0x4a0] sm:$0xff]  ;;  %v2876_v33 = vld [vmem:[%s2399_s26 + $0x128] sm:$0xff] }
  0x97   : > { %644 = vmatmul.mubr.f32.gmra.mxu0 %v2780_v34  ;;  %788 = vmatmul.mubr.f32.gmra.mxu1 %v251_v35  ;;  %v2879_v35 = vld [vmem:[%s2399_s26 + $0x2a8] sm:$0xff] }
  0x98   : > { %886 = vmatprep.subr.mxu1 %v442_v38  ;;  %1239 = vmatprep.subr.mxu0 %v444_v39  ;;  %v2882_v38 = vld [vmem:[%s2399_s26 + $0x120] sm:$0xff] }
  0x99   : > { %887 = vmatpush2.msra.mxu1 %v441_v41  ;;  %1240 = vmatpush2.msra.mxu0 %v443_v43  ;;  %v259_v39 = vld [vmem:[%s2399_s26 + $0x2a0] sm:$0xff]  ;;  %v412_v41 = vld [vmem:[%s3883_s1 + $0x468] sm:$0xff]  ;;  %v414_v43 = vld [vmem:[%s3883_s1 + $0x478] sm:$0xff] }
  0x9a   : > { %649 = vmatprep.mubr.f32.mxu0 %v2798_v44  ;;  %793 = vmatprep.mubr.f32.mxu1 %v254_v45  ;;  %v411_v45 = vld [vmem:[%s3883_s1 + $0x460] sm:$0xff] }
  0x9b   : > { %650 = vmatmul.mubr.f32.gmra.mxu0 %v2802_v47  ;;  %794 = vmatmul.mubr.f32.gmra.mxu1 %v253_v48  ;;  %v413_v48 = vld [vmem:[%s3883_s1 + $0x470] sm:$0xff] }
  0x9c   : > { %888 = vmatprep.subr.mxu1 %v436_v51  ;;  %1241 = vmatprep.subr.mxu0 %v438_v52  ;;  %v2901_v51 = vld [vmem:[%s2399_s26 + $0x138] sm:$0xff] }
  0x9d   : > { %889 = vmatpush2.msra.mxu1 %v435_v53  ;;  %1242 = vmatpush2.msra.mxu0 %v437_v55  ;;  %v2904_v52 = vld [vmem:[%s2399_s26 + $0x2b8] sm:$0xff]  ;;  %v408_v55 = vld [vmem:[%s3883_s1 + $0x448] sm:$0xff] }
  0x9e   : > { %655 = vmatprep.mubr.f32.mxu0 %v2820_v57  ;;  %799 = vmatprep.mubr.f32.mxu1 %v256_v59  ;;  %v406_v53 = vld [vmem:[%s3883_s1 + $0x438] sm:$0xff]  ;;  %v2913_v59 = vld [vmem:[%s2399_s26 + $0x130] sm:$0xff] }
  0x9f   : > { %890 = vmatprep.subr.mxu1 %v430_v60  ;;  %1243 = vmatprep.subr.mxu0 %v432_v61  ;;  %v2916_v60 = vld [vmem:[%s2399_s26 + $0x2b0] sm:$0xff] }
  0xa0   : > { %656 = vmatmul.mubr.f32.gmra.mxu0 %v2830_v63  ;;  %800 = vmatmul.mubr.f32.gmra.mxu1 %v255_v4  ;;  %v405_v61 = vld [vmem:[%s3883_s1 + $0x430] sm:$0xff]  ;;  %v407_v4 = vld [vmem:[%s3883_s1 + $0x440] sm:$0xff] }
  0xa1   : > { %891 = vmatpush2.msra.mxu1 %v429_v5  ;;  %1244 = vmatpush2.msra.mxu0 %v431_v7  ;;  %v400_v5 = vld [vmem:[%s3883_s1 + $0x408] sm:$0xff]  ;;  %v402_v7 = vld [vmem:[%s3883_s1 + $0x418] sm:$0xff] }
  0xa2   : > { %892 = vmatprep.subr.mxu1 %v424_v9  ;;  %1245 = vmatprep.subr.mxu0 %v426_v10  ;;  %v2935_v9 = vld [vmem:[%s2399_s26 + $0x148] sm:$0xff] }
  0xa3   : > { %661 = vmatprep.mubr.f32.mxu0 %v2848_v13  ;;  %805 = vmatprep.mubr.f32.mxu1 %v258_v15  ;;  %v2938_v10 = vld [vmem:[%s2399_s26 + $0x2c8] sm:$0xff]  ;;  %v399_v15 = vld [vmem:[%s3883_s1 + $0x400] sm:$0xff] }
  0xa4   : > { %893 = vmatpush2.msra.mxu1 %v423_v16  ;;  %1246 = vmatpush2.msra.mxu0 %v425_v20  ;;  %v401_v16 = vld [vmem:[%s3883_s1 + $0x410] sm:$0xff]  ;;  %v2947_v20 = vld [vmem:[%s2399_s26 + $0x140] sm:$0xff] }
  0xa5   : > { %662 = vmatmul.mubr.f32.gmra.mxu0 %v2858_v21  ;;  %806 = vmatmul.mubr.f32.gmra.mxu1 %v257_v23  ;;  %v2950_v23 = vld [vmem:[%s2399_s26 + $0x2c0] sm:$0xff] }
  0xa6   : > { %894 = vmatprep.subr.mxu1 %v418_v24  ;;  %1247 = vmatprep.subr.mxu0 %v420_v25  ;;  %v394_v24 = vld [vmem:[%s3883_s1 + $0x3d8] sm:$0xff]  ;;  %v396_v25 = vld [vmem:[%s3883_s1 + $0x3e8] sm:$0xff] }
  0xa7   : > { %895 = vmatpush2.msra.mxu1 %v417_v31  ;;  %1248 = vmatpush2.msra.mxu0 %v419_v32  ;;  %v393_v31 = vld [vmem:[%s3883_s1 + $0x3d0] sm:$0xff]  ;;  %v395_v32 = vld [vmem:[%s3883_s1 + $0x3e0] sm:$0xff] }
  0xa8   : > { %667 = vmatprep.mubr.f32.mxu0 %v2876_v33  ;;  %811 = vmatprep.mubr.f32.mxu1 %v2879_v35 }
  0xa9   : > { %668 = vmatmul.mubr.f32.gmra.mxu0 %v2882_v38  ;;  %812 = vmatmul.mubr.f32.gmra.mxu1 %v259_v39  ;;  %v2969_v39 = vld [vmem:[%s2399_s26 + $0x158] sm:$0xff] }
  0xaa   : > { %896 = vmatprep.subr.mxu1 %v412_v41  ;;  %1249 = vmatprep.subr.mxu0 %v414_v43  ;;  %v2972_v41 = vld [vmem:[%s2399_s26 + $0x2d8] sm:$0xff]  ;;  %v2975_v43 = vld [vmem:[%s2399_s26 + $0x150] sm:$0xff] }
  0xab   : > { %897 = vmatpush2.msra.mxu1 %v411_v45  ;;  %1250 = vmatpush2.msra.mxu0 %v413_v48  ;;  %v2978_v45 = vld [vmem:[%s2399_s26 + $0x2d0] sm:$0xff]  ;;  %v388_v48 = vld [vmem:[%s3883_s1 + $0x3a8] sm:$0xff] }
  0xac   : > { %673 = vmatprep.mubr.f32.mxu0 %v2901_v51  ;;  %817 = vmatprep.mubr.f32.mxu1 %v2904_v52 }
  0xad   : > { %898 = vmatprep.subr.mxu1 %v406_v53  ;;  %1251 = vmatprep.subr.mxu0 %v408_v55  ;;  %v390_v53 = vld [vmem:[%s3883_s1 + $0x3b8] sm:$0xff]  ;;  %v387_v55 = vld [vmem:[%s3883_s1 + $0x3a0] sm:$0xff] }
  0xae   : > { %674 = vmatmul.mubr.f32.gmra.mxu0 %v2913_v59  ;;  %818 = vmatmul.mubr.f32.gmra.mxu1 %v2916_v60 }
  0xaf   : > { %899 = vmatpush2.msra.mxu1 %v405_v61  ;;  %1252 = vmatpush2.msra.mxu0 %v407_v4  ;;  %v389_v61 = vld [vmem:[%s3883_s1 + $0x3b0] sm:$0xff]  ;;  %v2997_v4 = vld [vmem:[%s2399_s26 + $0x168] sm:$0xff] }
  0xb0   : > { %900 = vmatprep.subr.mxu1 %v400_v5  ;;  %1253 = vmatprep.subr.mxu0 %v402_v7  ;;  %v3000_v5 = vld [vmem:[%s2399_s26 + $0x2e8] sm:$0xff]  ;;  %v382_v7 = vld [vmem:[%s3883_s1 + $0x378] sm:$0xff] }
  0xb1   : > { %679 = vmatprep.mubr.f32.mxu0 %v2935_v9  ;;  %823 = vmatprep.mubr.f32.mxu1 %v2938_v10  ;;  %3890 = vst [vmem:[#allocation5_spill] sm:$0xff] %v3000_v5 }
  0xb2   : > { %901 = vmatpush2.msra.mxu1 %v399_v15  ;;  %1254 = vmatpush2.msra.mxu0 %v401_v16  ;;  %v384_v15 = vld [vmem:[%s3883_s1 + $0x388] sm:$0xff]  ;;  %v3009_v16 = vld [vmem:[%s2399_s26 + $0x160] sm:$0xff] }
  0xb3   : > { %680 = vmatmul.mubr.f32.gmra.mxu0 %v2947_v20  ;;  %824 = vmatmul.mubr.f32.gmra.mxu1 %v2950_v23 }
  0xb4   : > { %902 = vmatprep.subr.mxu1 %v394_v24  ;;  %1255 = vmatprep.subr.mxu0 %v396_v25  ;;  %v3012_v24 = vld [vmem:[%s2399_s26 + $0x2e0] sm:$0xff]  ;;  %v381_v25 = vld [vmem:[%s3883_s1 + $0x370] sm:$0xff] }
  0xb5   : > { %903 = vmatpush2.msra.mxu1 %v393_v31  ;;  %1256 = vmatpush2.msra.mxu0 %v395_v32  ;;  %v383_v31 = vld [vmem:[%s3883_s1 + $0x380] sm:$0xff]  ;;  %v376_v32 = vld [vmem:[%s3883_s1 + $0x348] sm:$0xff] }
  0xb6   : > { %685 = vmatprep.mubr.f32.mxu0 %v2969_v39  ;;  %829 = vmatprep.mubr.f32.mxu1 %v2972_v41 }
  0xb7   : > { %686 = vmatmul.mubr.f32.gmra.mxu0 %v2975_v43  ;;  %830 = vmatmul.mubr.f32.gmra.mxu1 %v2978_v45 }
  0xb8   : > { %904 = vmatprep.subr.mxu1 %v388_v48  ;;  %1257 = vmatprep.subr.mxu0 %v390_v53  ;;  %v378_v48 = vld [vmem:[%s3883_s1 + $0x358] sm:$0xff] }
  0xb9   : > { %905 = vmatpush2.msra.mxu1 %v387_v55  ;;  %1258 = vmatpush2.msra.mxu0 %v389_v61  ;;  %v3031_v53 = vld [vmem:[%s2399_s26 + $0x178] sm:$0xff]  ;;  %v375_v61 = vld [vmem:[%s3883_s1 + $0x340] sm:$0xff] }
  0xba   : > { %691 = vmatprep.mubr.f32.mxu0 %v2997_v4  ;;  %835 = vmatprep.mubr.f32.mxu1 %v3000_v5  ;;  %v3034_v55 = vld [vmem:[%s2399_s26 + $0x2f8] sm:$0xff]  ;;  %v3046_v5 = vld [vmem:[%s2399_s26 + $0x2f0] sm:$0xff] }
  0xbb   : > { %906 = vmatprep.subr.mxu1 %v382_v7  ;;  %1259 = vmatprep.subr.mxu0 %v384_v15  ;;  %v377_v7 = vld [vmem:[%s3883_s1 + $0x350] sm:$0xff] }
  0xbc   : > { %692 = vmatmul.mubr.f32.gmra.mxu0 %v3009_v16  ;;  %836 = vmatmul.mubr.f32.gmra.mxu1 %v3012_v24  ;;  %v3043_v15 = vld [vmem:[%s2399_s26 + $0x170] sm:$0xff] }
  0xbd   : > { %907 = vmatpush2.msra.mxu1 %v381_v25  ;;  %1260 = vmatpush2.msra.mxu0 %v383_v31  ;;  %v370_v25 = vld [vmem:[%s3883_s1 + $0x318] sm:$0xff]  ;;  %v372_v31 = vld [vmem:[%s3883_s1 + $0x328] sm:$0xff] }
  0xbe   : > { %908 = vmatprep.subr.mxu1 %v376_v32  ;;  %1261 = vmatprep.subr.mxu0 %v378_v48  ;;  %v369_v32 = vld [vmem:[%s3883_s1 + $0x310] sm:$0xff]  ;;  %v371_v48 = vld [vmem:[%s3883_s1 + $0x320] sm:$0xff] }
  0xbf   : > { %697 = vmatprep.mubr.f32.mxu0 %v3031_v53  ;;  %841 = vmatprep.mubr.f32.mxu1 %v3034_v55 }
  0xc0   : > { %909 = vmatpush2.msra.mxu1 %v375_v61  ;;  %1262 = vmatpush2.msra.mxu0 %v377_v7  ;;  %v2041_v61 = vld [vmem:[%s2399_s26 + $0x1a8] sm:$0xff] }
  0xc1   : > { %698 = vmatmul.mubr.f32.gmra.mxu0 %v3043_v15  ;;  %842 = vmatmul.mubr.f32.gmra.mxu1 %v3046_v5 }
  0xc2   : > { %910 = vmatprep.subr.mxu1 %v370_v25  ;;  %1263 = vmatprep.subr.mxu0 %v372_v31 }
  0xc3   : > { %911 = vmatpush2.msra.mxu1 %v369_v32  ;;  %1264 = vmatpush2.msra.mxu0 %v371_v48  ;;  %v2042_v32 = vld [vmem:[%s2399_s26 + $0x1a0] sm:$0xff] }
  0xc4   : > { %912 = vmatprep.mubr.f32.mxu1 %v2408_v0  ;;  %1265 = vmatprep.mubr.f32.mxu0 %v2408_v0  ;;  %v465_v0 = vlaneseq }
  0xc5   : > { %913 = vmatmul.mubr.f32.vlgmr.msra.gmra.mxu1 %v2412_v2  ;;  %1266 = vmatmul.mubr.f32.vlgmr.msra.gmra.mxu0 %v2412_v2 }
  0xc6   : > { %918 = vmatprep.mubr.f32.mxu1 %v2430_v8  ;;  %1271 = vmatprep.mubr.f32.mxu0 %v2430_v8  ;;  %v3138_v2 = vshrl.u32 %v465_v0, 7 }
  0xc8   : > { %v467_v8 = vsub.s32 0, %v3138_v2 }
  0xc9   : > { %919 = vmatmul.mubr.f32.gmra.mxu1 %v2440_v12  ;;  %1272 = vmatmul.mubr.f32.gmra.mxu0 %v2440_v12  ;;  %v3149_v12 = vld [vmem:[%s3884_s2] sm:$0x3f] }
  0xca   : > { %924 = vmatprep.mubr.f32.mxu1 %v2458_v18  ;;  %1277 = vmatprep.mubr.f32.mxu0 %v2458_v18  ;;  %v471_v18 = vsub.s32 1, %v3138_v2 }
  0xcd   : > { %925 = vmatmul.mubr.f32.gmra.mxu1 %v2468_v22  ;;  %1278 = vmatmul.mubr.f32.gmra.mxu0 %v2468_v22  ;;  %v3159_v22 = vrot.slane %v3149_v12, %v467_v8  ;;  %v2043_v8 = vld [vmem:[%s2399_s26 + $0x1b8] sm:$0xff] }
  0xce   : > { %930 = vmatprep.mubr.f32.mxu1 %v2486_v28  ;;  %1283 = vmatprep.mubr.f32.mxu0 %v2486_v28  ;;  %v3162_v28 = vrot.slane %v3149_v12, %v471_v18 }
  0xd1   : > { %931 = vmatmul.mubr.f32.gmra.mxu1 %v2490_v30  ;;  %1284 = vmatmul.mubr.f32.gmra.mxu0 %v2490_v30 }
  0xd2   : > { %936 = vmatprep.mubr.f32.mxu1 %v2508_v36  ;;  %1289 = vmatprep.mubr.f32.mxu0 %v2508_v36 }
  0xd5   : > { %937 = vmatmul.mubr.f32.gmra.mxu1 %v2518_v40  ;;  %1290 = vmatmul.mubr.f32.gmra.mxu0 %v2518_v40 }
  0xd6   : > { %942 = vmatprep.mubr.f32.mxu1 %v2536_v46  ;;  %1295 = vmatprep.mubr.f32.mxu0 %v2536_v46 }
  0xd9   : > { %943 = vmatmul.mubr.f32.gmra.mxu1 %v2546_v50  ;;  %1296 = vmatmul.mubr.f32.gmra.mxu0 %v2546_v50 }
  0xda   : > { %948 = vmatprep.mubr.f32.mxu1 %v2564_v56  ;;  %1301 = vmatprep.mubr.f32.mxu0 %v2564_v56 }
  0xdd   : > { %949 = vmatmul.mubr.f32.gmra.mxu1 %v2568_v58  ;;  %1302 = vmatmul.mubr.f32.gmra.mxu0 %v2568_v58 }
  0xde   : > { %954 = vmatprep.mubr.f32.mxu1 %v2586_v1  ;;  %1307 = vmatprep.mubr.f32.mxu0 %v2586_v1 }
  0xe1   : > { %955 = vmatmul.mubr.f32.gmra.mxu1 %v2596_v6  ;;  %1308 = vmatmul.mubr.f32.gmra.mxu0 %v2596_v6 }
  0xe2   : > { %960 = vmatprep.mubr.f32.mxu1 %v2614_v14  ;;  %1313 = vmatprep.mubr.f32.mxu0 %v2614_v14 }
  0xe5   : > { %961 = vmatmul.mubr.f32.gmra.mxu1 %v2624_v19  ;;  %1314 = vmatmul.mubr.f32.gmra.mxu0 %v2624_v19 }
  0xe6   : > { %966 = vmatprep.mubr.f32.mxu1 %v2642_v26  ;;  %1319 = vmatprep.mubr.f32.mxu0 %v2642_v26 }
  0xe9   : > { %967 = vmatmul.mubr.f32.gmra.mxu1 %v2646_v29  ;;  %1320 = vmatmul.mubr.f32.gmra.mxu0 %v2646_v29 }
  0xea   : > { %972 = vmatprep.mubr.f32.mxu1 %v2664_v37  ;;  %1325 = vmatprep.mubr.f32.mxu0 %v2664_v37 }
  0xed   : > { %973 = vmatmul.mubr.f32.gmra.mxu1 %v2674_v42  ;;  %1326 = vmatmul.mubr.f32.gmra.mxu0 %v2674_v42 }
  0xee   : > { %978 = vmatprep.mubr.f32.mxu1 %v2692_v49  ;;  %1331 = vmatprep.mubr.f32.mxu0 %v2692_v49 }
  0xf1   : > { %979 = vmatmul.mubr.f32.gmra.mxu1 %v2702_v54  ;;  %1332 = vmatmul.mubr.f32.gmra.mxu0 %v2702_v54 }
  0xf2   : > { %984 = vmatprep.mubr.f32.mxu1 %v2720_v62  ;;  %1337 = vmatprep.mubr.f32.mxu0 %v2720_v62 }
  0xf5   : > { %985 = vmatmul.mubr.f32.gmra.mxu1 %v2724_v3  ;;  %1338 = vmatmul.mubr.f32.gmra.mxu0 %v2724_v3 }
  0xf6   : > { %990 = vmatprep.mubr.f32.mxu1 %v2742_v11  ;;  %1343 = vmatprep.mubr.f32.mxu0 %v2742_v11 }
  0xf9   : > { %991 = vmatmul.mubr.f32.gmra.mxu1 %v2752_v17  ;;  %1344 = vmatmul.mubr.f32.gmra.mxu0 %v2752_v17 }
  0xfa   : > { %996 = vmatprep.mubr.f32.mxu1 %v2770_v27  ;;  %1349 = vmatprep.mubr.f32.mxu0 %v2770_v27 }
  0xfd   : > { %997 = vmatmul.mubr.f32.gmra.mxu1 %v2780_v34  ;;  %1350 = vmatmul.mubr.f32.gmra.mxu0 %v2780_v34  ;;  %v2037_v34 = vld [vmem:[%s2399_s26 + $0x188] sm:$0xff] }
  0xfe   : > { %1002 = vmatprep.mubr.f32.mxu1 %v2798_v44  ;;  %1355 = vmatprep.mubr.f32.mxu0 %v2798_v44 }
 0x101   : > { %1003 = vmatmul.mubr.f32.gmra.mxu1 %v2802_v47  ;;  %1356 = vmatmul.mubr.f32.gmra.mxu0 %v2802_v47 }
 0x102   : > { %1008 = vmatprep.mubr.f32.mxu1 %v2820_v57  ;;  %1361 = vmatprep.mubr.f32.mxu0 %v2820_v57 }
 0x105   : > { %1009 = vmatmul.mubr.f32.gmra.mxu1 %v2830_v63  ;;  %1362 = vmatmul.mubr.f32.gmra.mxu0 %v2830_v63 }
 0x106   : > { %1014 = vmatprep.mubr.f32.mxu1 %v2848_v13  ;;  %1367 = vmatprep.mubr.f32.mxu0 %v2848_v13 }
 0x109   : > { %1015 = vmatmul.mubr.f32.gmra.mxu1 %v2858_v21  ;;  %1368 = vmatmul.mubr.f32.gmra.mxu0 %v2858_v21 }
 0x10a   : > { %1020 = vmatprep.mubr.f32.mxu1 %v2876_v33  ;;  %1373 = vmatprep.mubr.f32.mxu0 %v2876_v33  ;;  %v2038_v33 = vld [vmem:[%s2399_s26 + $0x180] sm:$0xff] }
 0x10d   : > { %1021 = vmatmul.mubr.f32.gmra.mxu1 %v2882_v38  ;;  %1374 = vmatmul.mubr.f32.gmra.mxu0 %v2882_v38 }
 0x10e   : > { %1026 = vmatprep.mubr.f32.mxu1 %v2901_v51  ;;  %1379 = vmatprep.mubr.f32.mxu0 %v2901_v51 }
 0x111   : > { %1027 = vmatmul.mubr.f32.gmra.mxu1 %v2913_v59  ;;  %1380 = vmatmul.mubr.f32.gmra.mxu0 %v2913_v59  ;;  %v2039_v59 = vld [vmem:[%s2399_s26 + $0x198] sm:$0xff] }
 0x112   : > { %1032 = vmatprep.mubr.f32.mxu1 %v2935_v9  ;;  %1385 = vmatprep.mubr.f32.mxu0 %v2935_v9 }
 0x115   : > { %1033 = vmatmul.mubr.f32.gmra.mxu1 %v2947_v20  ;;  %1386 = vmatmul.mubr.f32.gmra.mxu0 %v2947_v20  ;;  %v561_v30 = vpop.f32.mrf.mxu0  ;;  %v705_v36 = vpop.f32.mrf.mxu1 }
 0x116   : > { %1038 = vmatprep.mubr.f32.mxu1 %v2969_v39  ;;  %1391 = vmatprep.mubr.f32.mxu0 %v2969_v39  ;;  %v562_v40 = vadd.f32 %v561_v30, %v3159_v22  ;;  %v706_v46 = vadd.f32 %v705_v36, %v3159_v22 }
 0x117   : > { %v563_v50 = vpop.f32.mrf.mxu0  ;;  %v707_v56 = vpop.f32.mrf.mxu1 }
 0x118   : > { %1554 = vst [vmem:[%s3170_s10] sm:$0xff] %v562_v40  ;;  %1698 = vst [vmem:[%s3170_s10 + $0x480] sm:$0xff] %v706_v46  ;;  %v564_v58 = vadd.f32 %v563_v50, %v3162_v28  ;;  %v708_v1 = vadd.f32 %v707_v56, %v3162_v28  ;;  %v2044_v56 = vld [vmem:[%s2399_s26 + $0x1b0] sm:$0xff] }
 0x119   : > { %1039 = vmatmul.mubr.f32.gmra.mxu1 %v2975_v43  ;;  %1392 = vmatmul.mubr.f32.gmra.mxu0 %v2975_v43 }
 0x11a   : > { %1044 = vmatprep.mubr.f32.mxu1 %v2997_v4  ;;  %1397 = vmatprep.mubr.f32.mxu0 %v2997_v4  ;;  %1555 = vst [vmem:[%s3170_s10 + $0x8] sm:$0xff] %v564_v58  ;;  %1699 = vst [vmem:[%s3170_s10 + $0x488] sm:$0xff] %v708_v1  ;;  %v567_v6 = vpop.f32.mrf.mxu0  ;;  %v711_v14 = vpop.f32.mrf.mxu1  ;;  %v2040_v4 = vld [vmem:[%s2399_s26 + $0x190] sm:$0xff] }
 0x11b   : > { %v568_v19 = vadd.f32 %v567_v6, %v3159_v22  ;;  %v712_v26 = vadd.f32 %v711_v14, %v3159_v22  ;;  %v2045_v6 = vld [vmem:[%s2399_s26 + $0x1c8] sm:$0xff] }
 0x11c   : > { %v569_v29 = vpop.f32.mrf.mxu0  ;;  %v713_v37 = vpop.f32.mrf.mxu1 }
 0x11d   : > { %1045 = vmatmul.mubr.f32.gmra.mxu1 %v3009_v16  ;;  %1398 = vmatmul.mubr.f32.gmra.mxu0 %v3009_v16  ;;  %1560 = vst [vmem:[%s3170_s10 + $0x30] sm:$0xff] %v568_v19  ;;  %1704 = vst [vmem:[%s3170_s10 + $0x4b0] sm:$0xff] %v712_v26  ;;  %v570_v42 = vadd.f32 %v569_v29, %v3162_v28  ;;  %v714_v49 = vadd.f32 %v713_v37, %v3162_v28 }
 0x11e   : > { %1050 = vmatprep.mubr.f32.mxu1 %v3031_v53  ;;  %1403 = vmatprep.mubr.f32.mxu0 %v3031_v53 }
 0x11f   : > { %1561 = vst [vmem:[%s3170_s10 + $0x38] sm:$0xff] %v570_v42  ;;  %1705 = vst [vmem:[%s3170_s10 + $0x4b8] sm:$0xff] %v714_v49  ;;  %v573_v54 = vpop.f32.mrf.mxu0  ;;  %v717_v62 = vpop.f32.mrf.mxu1  ;;  %v2046_v49 = vld [vmem:[%s2399_s26 + $0x1c0] sm:$0xff] }
 0x120   : > { %v574_v3 = vadd.f32 %v573_v54, %v3159_v22  ;;  %v718_v11 = vadd.f32 %v717_v62, %v3159_v22  ;;  %v2047_v54 = vld [vmem:[%s2399_s26 + $0x1d8] sm:$0xff] }
 0x121   : > { %1051 = vmatmul.mubr.f32.gmra.mxu1 %v3043_v15  ;;  %1404 = vmatmul.mubr.f32.gmra.mxu0 %v3043_v15  ;;  %v575_v17 = vpop.f32.mrf.mxu0  ;;  %v719_v27 = vpop.f32.mrf.mxu1 }
 0x122   : > { %1056 = vmatprep.mubr.f32.mxu1 %v2037_v34  ;;  %1409 = vmatprep.mubr.f32.mxu0 %v2037_v34  ;;  %1566 = vst [vmem:[%s3170_s10 + $0x60] sm:$0xff] %v574_v3  ;;  %1710 = vst [vmem:[%s3170_s10 + $0x4e0] sm:$0xff] %v718_v11  ;;  %v576_v44 = vadd.f32 %v575_v17, %v3162_v28  ;;  %v720_v47 = vadd.f32 %v719_v27, %v3162_v28 }
 0x123   : > { %v579_v57 = vpop.f32.mrf.mxu0  ;;  %v723_v63 = vpop.f32.mrf.mxu1 }
 0x124   : > { %1567 = vst [vmem:[%s3170_s10 + $0x68] sm:$0xff] %v576_v44  ;;  %1711 = vst [vmem:[%s3170_s10 + $0x4e8] sm:$0xff] %v720_v47  ;;  %v580_v13 = vadd.f32 %v579_v57, %v3159_v22  ;;  %v724_v21 = vadd.f32 %v723_v63, %v3159_v22  ;;  %v2048_v44 = vld [vmem:[%s2399_s26 + $0x1d0] sm:$0xff]  ;;  %v2049_v63 = vld [vmem:[%s2399_s26 + $0x1e8] sm:$0xff] }
 0x125   : > { %1057 = vmatmul.mubr.f32.gmra.mxu1 %v2038_v33  ;;  %1410 = vmatmul.mubr.f32.gmra.mxu0 %v2038_v33  ;;  %v581_v38 = vpop.f32.mrf.mxu0  ;;  %v725_v51 = vpop.f32.mrf.mxu1 }
 0x126   : > { %1062 = vmatprep.mubr.f32.mxu1 %v2039_v59  ;;  %1415 = vmatprep.mubr.f32.mxu0 %v2039_v59  ;;  %1572 = vst [vmem:[%s3170_s10 + $0x90] sm:$0xff] %v580_v13  ;;  %1716 = vst [vmem:[%s3170_s10 + $0x510] sm:$0xff] %v724_v21  ;;  %v582_v9 = vadd.f32 %v581_v38, %v3162_v28  ;;  %v726_v20 = vadd.f32 %v725_v51, %v3162_v28  ;;  %v2050_v51 = vld [vmem:[%s2399_s26 + $0x1e0] sm:$0xff] }
 0x128   : > { %1573 = vst [vmem:[%s3170_s10 + $0x98] sm:$0xff] %v582_v9  ;;  %1717 = vst [vmem:[%s3170_s10 + $0x518] sm:$0xff] %v726_v20  ;;  %v585_v39 = vpop.f32.mrf.mxu0  ;;  %v729_v43 = vpop.f32.mrf.mxu1  ;;  %v2051_v20 = vld [vmem:[%s2399_s26 + $0x1f8] sm:$0xff] }
 0x129   : > { %1063 = vmatmul.mubr.f32.gmra.mxu1 %v2040_v4  ;;  %1416 = vmatmul.mubr.f32.gmra.mxu0 %v2040_v4  ;;  %v586_v16 = vadd.f32 %v585_v39, %v3159_v22  ;;  %v730_v53 = vadd.f32 %v729_v43, %v3159_v22 }
 0x12a   : > { %1068 = vmatprep.mubr.f32.mxu1 %v2041_v61  ;;  %1421 = vmatprep.mubr.f32.mxu0 %v2041_v61  ;;  %v587_v7 = vpop.f32.mrf.mxu0  ;;  %v731_v15 = vpop.f32.mrf.mxu1 }
 0x12b   : > { %1578 = vst [vmem:[%s3170_s10 + $0xc0] sm:$0xff] %v586_v16  ;;  %1722 = vst [vmem:[%s3170_s10 + $0x540] sm:$0xff] %v730_v53  ;;  %v588_v25 = vadd.f32 %v587_v7, %v3162_v28  ;;  %v732_v31 = vadd.f32 %v731_v15, %v3162_v28  ;;  %v2052_v7 = vld [vmem:[%s2399_s26 + $0x1f0] sm:$0xff] }
 0x12d   : > { %1069 = vmatmul.mubr.f32.gmra.mxu1 %v2042_v32  ;;  %1422 = vmatmul.mubr.f32.gmra.mxu0 %v2042_v32  ;;  %1579 = vst [vmem:[%s3170_s10 + $0xc8] sm:$0xff] %v588_v25  ;;  %1723 = vst [vmem:[%s3170_s10 + $0x548] sm:$0xff] %v732_v31  ;;  %v591_v48 = vpop.f32.mrf.mxu0  ;;  %v735_v0 = vpop.f32.mrf.mxu1  ;;  %v2053_v31 = vld [vmem:[%s2399_s26 + $0x208] sm:$0xff] }
 0x12e   : > { %1074 = vmatprep.mubr.f32.mxu1 %v2043_v8  ;;  %1427 = vmatprep.mubr.f32.mxu0 %v2043_v8  ;;  %v592_v18 = vadd.f32 %v591_v48, %v3159_v22  ;;  %v736_v30 = vadd.f32 %v735_v0, %v3159_v22 }
 0x12f   : > { %v593_v36 = vpop.f32.mrf.mxu0  ;;  %v737_v40 = vpop.f32.mrf.mxu1 }
 0x130   : > { %1584 = vst [vmem:[%s3170_s10 + $0xf0] sm:$0xff] %v592_v18  ;;  %1728 = vst [vmem:[%s3170_s10 + $0x570] sm:$0xff] %v736_v30  ;;  %v594_v46 = vadd.f32 %v593_v36, %v3162_v28  ;;  %v738_v50 = vadd.f32 %v737_v40, %v3162_v28  ;;  %v2054_v18 = vld [vmem:[%s2399_s26 + $0x200] sm:$0xff]  ;;  %v2055_v40 = vld [vmem:[%s2399_s26 + $0x218] sm:$0xff] }
 0x131   : > { %1075 = vmatmul.mubr.f32.gmra.mxu1 %v2044_v56  ;;  %1428 = vmatmul.mubr.f32.gmra.mxu0 %v2044_v56  ;;  %v597_v58 = vpop.f32.mrf.mxu0  ;;  %v741_v1 = vpop.f32.mrf.mxu1 }
 0x132   : > { %1080 = vmatprep.mubr.f32.mxu1 %v2045_v6  ;;  %1433 = vmatprep.mubr.f32.mxu0 %v2045_v6  ;;  %1585 = vst [vmem:[%s3170_s10 + $0xf8] sm:$0xff] %v594_v46  ;;  %1729 = vst [vmem:[%s3170_s10 + $0x578] sm:$0xff] %v738_v50  ;;  %v598_v14 = vadd.f32 %v597_v58, %v3159_v22  ;;  %v742_v19 = vadd.f32 %v741_v1, %v3159_v22  ;;  %v2056_v1 = vld [vmem:[%s2399_s26 + $0x210] sm:$0xff] }
 0x133   : > { %v599_v26 = vpop.f32.mrf.mxu0  ;;  %v743_v29 = vpop.f32.mrf.mxu1 }
 0x134   : > { %1590 = vst [vmem:[%s3170_s10 + $0x120] sm:$0xff] %v598_v14  ;;  %1734 = vst [vmem:[%s3170_s10 + $0x5a0] sm:$0xff] %v742_v19  ;;  %v600_v37 = vadd.f32 %v599_v26, %v3162_v28  ;;  %v744_v42 = vadd.f32 %v743_v29, %v3162_v28  ;;  %v2057_v19 = vld [vmem:[%s2399_s26 + $0x228] sm:$0xff] }
 0x135   : > { %1081 = vmatmul.mubr.f32.gmra.mxu1 %v2046_v49  ;;  %1434 = vmatmul.mubr.f32.gmra.mxu0 %v2046_v49 }
 0x136   : > { %1086 = vmatprep.mubr.f32.mxu1 %v2047_v54  ;;  %1439 = vmatprep.mubr.f32.mxu0 %v2047_v54  ;;  %1591 = vst [vmem:[%s3170_s10 + $0x128] sm:$0xff] %v600_v37  ;;  %1735 = vst [vmem:[%s3170_s10 + $0x5a8] sm:$0xff] %v744_v42  ;;  %v603_v62 = vpop.f32.mrf.mxu0  ;;  %v747_v3 = vpop.f32.mrf.mxu1 }
 0x137   : > { %v604_v11 = vadd.f32 %v603_v62, %v3159_v22  ;;  %v748_v17 = vadd.f32 %v747_v3, %v3159_v22  ;;  %v2058_v62 = vld [vmem:[%s2399_s26 + $0x220] sm:$0xff] }
 0x138   : > { %v605_v27 = vpop.f32.mrf.mxu0  ;;  %v749_v34 = vpop.f32.mrf.mxu1 }
 0x139   : > { %1087 = vmatmul.mubr.f32.gmra.mxu1 %v2048_v44  ;;  %1440 = vmatmul.mubr.f32.gmra.mxu0 %v2048_v44  ;;  %1596 = vst [vmem:[%s3170_s10 + $0x150] sm:$0xff] %v604_v11  ;;  %1740 = vst [vmem:[%s3170_s10 + $0x5d0] sm:$0xff] %v748_v17  ;;  %v606_v47 = vadd.f32 %v605_v27, %v3162_v28  ;;  %v750_v57 = vadd.f32 %v749_v34, %v3162_v28  ;;  %v2059_v17 = vld [vmem:[%s2399_s26 + $0x238] sm:$0xff] }
 0x13a   : > { %1092 = vmatprep.mubr.f32.mxu1 %v2049_v63  ;;  %1445 = vmatprep.mubr.f32.mxu0 %v2049_v63 }
 0x13b   : > { %1597 = vst [vmem:[%s3170_s10 + $0x158] sm:$0xff] %v606_v47  ;;  %1741 = vst [vmem:[%s3170_s10 + $0x5d8] sm:$0xff] %v750_v57  ;;  %v609_v13 = vpop.f32.mrf.mxu0  ;;  %v753_v21 = vpop.f32.mrf.mxu1 }
 0x13c   : > { %v610_v33 = vadd.f32 %v609_v13, %v3159_v22  ;;  %v754_v38 = vadd.f32 %v753_v21, %v3159_v22  ;;  %v2060_v13 = vld [vmem:[%s2399_s26 + $0x230] sm:$0xff]  ;;  %v2061_v21 = vld [vmem:[%s2399_s26 + $0x248] sm:$0xff] }
 0x13d   : > { %1093 = vmatmul.mubr.f32.gmra.mxu1 %v2050_v51  ;;  %1446 = vmatmul.mubr.f32.gmra.mxu0 %v2050_v51  ;;  %v611_v59 = vpop.f32.mrf.mxu0  ;;  %v755_v9 = vpop.f32.mrf.mxu1 }
 0x13e   : > { %1098 = vmatprep.mubr.f32.mxu1 %v2051_v20  ;;  %1451 = vmatprep.mubr.f32.mxu0 %v2051_v20  ;;  %1602 = vst [vmem:[%s3170_s10 + $0x180] sm:$0xff] %v610_v33  ;;  %1746 = vst [vmem:[%s3170_s10 + $0x600] sm:$0xff] %v754_v38  ;;  %v612_v39 = vadd.f32 %v611_v59, %v3162_v28  ;;  %v756_v43 = vadd.f32 %v755_v9, %v3162_v28 }
 0x13f   : > { %v615_v4 = vpop.f32.mrf.mxu0  ;;  %v759_v16 = vpop.f32.mrf.mxu1 }
 0x140   : > { %1603 = vst [vmem:[%s3170_s10 + $0x188] sm:$0xff] %v612_v39  ;;  %1747 = vst [vmem:[%s3170_s10 + $0x608] sm:$0xff] %v756_v43  ;;  %v616_v53 = vadd.f32 %v615_v4, %v3159_v22  ;;  %v760_v61 = vadd.f32 %v759_v16, %v3159_v22  ;;  %v2062_v39 = vld [vmem:[%s2399_s26 + $0x240] sm:$0xff]  ;;  %v2063_v16 = vld [vmem:[%s2399_s26 + $0x258] sm:$0xff] }
 0x141   : > { %1099 = vmatmul.mubr.f32.gmra.mxu1 %v2052_v7  ;;  %1452 = vmatmul.mubr.f32.gmra.mxu0 %v2052_v7  ;;  %v617_v15 = vpop.f32.mrf.mxu0  ;;  %v761_v25 = vpop.f32.mrf.mxu1 }
 0x142   : > { %1104 = vmatprep.mubr.f32.mxu1 %v2053_v31  ;;  %1457 = vmatprep.mubr.f32.mxu0 %v2053_v31  ;;  %1608 = vst [vmem:[%s3170_s10 + $0x1b0] sm:$0xff] %v616_v53  ;;  %1752 = vst [vmem:[%s3170_s10 + $0x630] sm:$0xff] %v760_v61  ;;  %v618_v32 = vadd.f32 %v617_v15, %v3162_v28  ;;  %v762_v48 = vadd.f32 %v761_v25, %v3162_v28  ;;  %v2064_v25 = vld [vmem:[%s2399_s26 + $0x250] sm:$0xff] }
 0x144   : > { %1609 = vst [vmem:[%s3170_s10 + $0x1b8] sm:$0xff] %v618_v32  ;;  %1753 = vst [vmem:[%s3170_s10 + $0x638] sm:$0xff] %v762_v48  ;;  %v621_v0 = vpop.f32.mrf.mxu0  ;;  %v765_v8 = vpop.f32.mrf.mxu1  ;;  %v2065_v48 = vld [vmem:[%s2399_s26 + $0x268] sm:$0xff] }
 0x145   : > { %1105 = vmatmul.mubr.f32.gmra.mxu1 %v2054_v18  ;;  %1458 = vmatmul.mubr.f32.gmra.mxu0 %v2054_v18  ;;  %v622_v30 = vadd.f32 %v621_v0, %v3159_v22  ;;  %v766_v36 = vadd.f32 %v765_v8, %v3159_v22 }
 0x146   : > { %1110 = vmatprep.mubr.f32.mxu1 %v2055_v40  ;;  %1463 = vmatprep.mubr.f32.mxu0 %v2055_v40  ;;  %v623_v46 = vpop.f32.mrf.mxu0  ;;  %v767_v50 = vpop.f32.mrf.mxu1 }
 0x147   : > { %1614 = vst [vmem:[%s3170_s10 + $0x1e0] sm:$0xff] %v622_v30  ;;  %1758 = vst [vmem:[%s3170_s10 + $0x660] sm:$0xff] %v766_v36  ;;  %v624_v56 = vadd.f32 %v623_v46, %v3162_v28  ;;  %v768_v58 = vadd.f32 %v767_v50, %v3162_v28  ;;  %v2066_v46 = vld [vmem:[%s2399_s26 + $0x260] sm:$0xff] }
 0x149   : > { %1111 = vmatmul.mubr.f32.gmra.mxu1 %v2056_v1  ;;  %1464 = vmatmul.mubr.f32.gmra.mxu0 %v2056_v1  ;;  %1615 = vst [vmem:[%s3170_s10 + $0x1e8] sm:$0xff] %v624_v56  ;;  %1759 = vst [vmem:[%s3170_s10 + $0x668] sm:$0xff] %v768_v58  ;;  %v627_v6 = vpop.f32.mrf.mxu0  ;;  %v771_v14 = vpop.f32.mrf.mxu1  ;;  %v2067_v58 = vld [vmem:[%s2399_s26 + $0x278] sm:$0xff] }
 0x14a   : > { %1116 = vmatprep.mubr.f32.mxu1 %v2057_v19  ;;  %1469 = vmatprep.mubr.f32.mxu0 %v2057_v19  ;;  %v628_v26 = vadd.f32 %v627_v6, %v3159_v22  ;;  %v772_v29 = vadd.f32 %v771_v14, %v3159_v22 }
 0x14b   : > { %v629_v37 = vpop.f32.mrf.mxu0  ;;  %v773_v42 = vpop.f32.mrf.mxu1 }
 0x14c   : > { %1620 = vst [vmem:[%s3170_s10 + $0x210] sm:$0xff] %v628_v26  ;;  %1764 = vst [vmem:[%s3170_s10 + $0x690] sm:$0xff] %v772_v29  ;;  %v630_v49 = vadd.f32 %v629_v37, %v3162_v28  ;;  %v774_v54 = vadd.f32 %v773_v42, %v3162_v28  ;;  %v2068_v26 = vld [vmem:[%s2399_s26 + $0x270] sm:$0xff]  ;;  %v2069_v42 = vld [vmem:[%s2399_s26 + $0x288] sm:$0xff] }
 0x14d   : > { %1117 = vmatmul.mubr.f32.gmra.mxu1 %v2058_v62  ;;  %1470 = vmatmul.mubr.f32.gmra.mxu0 %v2058_v62  ;;  %v633_v3 = vpop.f32.mrf.mxu0  ;;  %v777_v11 = vpop.f32.mrf.mxu1 }
 0x14e   : > { %1122 = vmatprep.mubr.f32.mxu1 %v2059_v17  ;;  %1475 = vmatprep.mubr.f32.mxu0 %v2059_v17  ;;  %1621 = vst [vmem:[%s3170_s10 + $0x218] sm:$0xff] %v630_v49  ;;  %1765 = vst [vmem:[%s3170_s10 + $0x698] sm:$0xff] %v774_v54  ;;  %v634_v27 = vadd.f32 %v633_v3, %v3159_v22  ;;  %v778_v34 = vadd.f32 %v777_v11, %v3159_v22  ;;  %v2070_v11 = vld [vmem:[%s2399_s26 + $0x280] sm:$0xff] }
 0x14f   : > { %v635_v44 = vpop.f32.mrf.mxu0  ;;  %v779_v47 = vpop.f32.mrf.mxu1 }
 0x150   : > { %1626 = vst [vmem:[%s3170_s10 + $0x240] sm:$0xff] %v634_v27  ;;  %1770 = vst [vmem:[%s3170_s10 + $0x6c0] sm:$0xff] %v778_v34  ;;  %v636_v57 = vadd.f32 %v635_v44, %v3162_v28  ;;  %v780_v63 = vadd.f32 %v779_v47, %v3162_v28  ;;  %v2071_v34 = vld [vmem:[%s2399_s26 + $0x298] sm:$0xff] }
 0x151   : > { %1123 = vmatmul.mubr.f32.gmra.mxu1 %v2060_v13  ;;  %1476 = vmatmul.mubr.f32.gmra.mxu0 %v2060_v13 }
 0x152   : > { %1128 = vmatprep.mubr.f32.mxu1 %v2061_v21  ;;  %1481 = vmatprep.mubr.f32.mxu0 %v2061_v21  ;;  %1627 = vst [vmem:[%s3170_s10 + $0x248] sm:$0xff] %v636_v57  ;;  %1771 = vst [vmem:[%s3170_s10 + $0x6c8] sm:$0xff] %v780_v63  ;;  %v639_v33 = vpop.f32.mrf.mxu0  ;;  %v783_v38 = vpop.f32.mrf.mxu1 }
 0x153   : > { %v640_v51 = vadd.f32 %v639_v33, %v3159_v22  ;;  %v784_v59 = vadd.f32 %v783_v38, %v3159_v22  ;;  %v2072_v33 = vld [vmem:[%s2399_s26 + $0x290] sm:$0xff] }
 0x154   : > { %v641_v9 = vpop.f32.mrf.mxu0  ;;  %v785_v20 = vpop.f32.mrf.mxu1 }
 0x155   : > { %1129 = vmatmul.mubr.f32.gmra.mxu1 %v2062_v39  ;;  %1482 = vmatmul.mubr.f32.gmra.mxu0 %v2062_v39  ;;  %1632 = vst [vmem:[%s3170_s10 + $0x270] sm:$0xff] %v640_v51  ;;  %1776 = vst [vmem:[%s3170_s10 + $0x6f0] sm:$0xff] %v784_v59  ;;  %v642_v43 = vadd.f32 %v641_v9, %v3162_v28  ;;  %v786_v4 = vadd.f32 %v785_v20, %v3162_v28  ;;  %v2073_v59 = vld [vmem:[%s2399_s26 + $0x2a8] sm:$0xff] }
 0x156   : > { %1134 = vmatprep.mubr.f32.mxu1 %v2063_v16  ;;  %1487 = vmatprep.mubr.f32.mxu0 %v2063_v16 }
 0x157   : > { %1633 = vst [vmem:[%s3170_s10 + $0x278] sm:$0xff] %v642_v43  ;;  %1777 = vst [vmem:[%s3170_s10 + $0x6f8] sm:$0xff] %v786_v4  ;;  %v645_v53 = vpop.f32.mrf.mxu0  ;;  %v789_v61 = vpop.f32.mrf.mxu1 }
 0x158   : > { %v646_v7 = vadd.f32 %v645_v53, %v3159_v22  ;;  %v790_v15 = vadd.f32 %v789_v61, %v3159_v22  ;;  %v2074_v53 = vld [vmem:[%s2399_s26 + $0x2a0] sm:$0xff] }
 0x159   : > { %1135 = vmatmul.mubr.f32.gmra.mxu1 %v2064_v25  ;;  %1488 = vmatmul.mubr.f32.gmra.mxu0 %v2064_v25  ;;  %v647_v31 = vpop.f32.mrf.mxu0  ;;  %v791_v32 = vpop.f32.mrf.mxu1 }
 0x15a   : > { %1140 = vmatprep.mubr.f32.mxu1 %v2065_v48  ;;  %1493 = vmatprep.mubr.f32.mxu0 %v2065_v48  ;;  %1638 = vst [vmem:[%s3170_s10 + $0x2a0] sm:$0xff] %v646_v7  ;;  %1782 = vst [vmem:[%s3170_s10 + $0x720] sm:$0xff] %v790_v15  ;;  %v648_v0 = vadd.f32 %v647_v31, %v3162_v28  ;;  %v792_v8 = vadd.f32 %v791_v32, %v3162_v28  ;;  %v2075_v32 = vld [vmem:[%s2399_s26 + $0x2b0] sm:$0xff]  ;;  %s2001_s26 = smul.u32 36864, %s2182_s16 }
 0x15b   : > { %v651_v18 = vpop.f32.mrf.mxu0  ;;  %v795_v30 = vpop.f32.mrf.mxu1 }
 0x15c   : > { %1639 = vst [vmem:[%s3170_s10 + $0x2a8] sm:$0xff] %v648_v0  ;;  %1783 = vst [vmem:[%s3170_s10 + $0x728] sm:$0xff] %v792_v8  ;;  %v652_v36 = vadd.f32 %v651_v18, %v3159_v22  ;;  %v796_v40 = vadd.f32 %v795_v30, %v3159_v22  ;;  %s3830_s19 = scalar_lea.hbm %s3885_s3, %s2001_s26 }
 0x15d   : > { %1141 = vmatmul.mubr.f32.gmra.mxu1 %v2066_v46  ;;  %1494 = vmatmul.mubr.f32.gmra.mxu0 %v2066_v46  ;;  %v653_v50 = vpop.f32.mrf.mxu0  ;;  %v797_v56 = vpop.f32.mrf.mxu1 }
 0x15e   : > { %1146 = vmatprep.mubr.f32.mxu1 %v2067_v58  ;;  %1499 = vmatprep.mubr.f32.mxu0 %v2067_v58  ;;  %1644 = vst [vmem:[%s3170_s10 + $0x2d0] sm:$0xff] %v652_v36  ;;  %1788 = vst [vmem:[%s3170_s10 + $0x750] sm:$0xff] %v796_v40  ;;  %v654_v1 = vadd.f32 %v653_v50, %v3162_v28  ;;  %v798_v6 = vadd.f32 %v797_v56, %v3162_v28 }
 0x160   : > { %1645 = vst [vmem:[%s3170_s10 + $0x2d8] sm:$0xff] %v654_v1  ;;  %1789 = vst [vmem:[%s3170_s10 + $0x758] sm:$0xff] %v798_v6  ;;  %v657_v14 = vpop.f32.mrf.mxu0  ;;  %v801_v19 = vpop.f32.mrf.mxu1 }
 0x161   : > { %1147 = vmatmul.mubr.f32.gmra.mxu1 %v2068_v26  ;;  %1500 = vmatmul.mubr.f32.gmra.mxu0 %v2068_v26  ;;  %v658_v29 = vadd.f32 %v657_v14, %v3159_v22  ;;  %v802_v37 = vadd.f32 %v801_v19, %v3159_v22  ;;  %v3891_v14 = vld [vmem:[#allocation5_spill] sm:$0xff] }
 0x162   : > { %1152 = vmatprep.mubr.f32.mxu1 %v2069_v42  ;;  %1505 = vmatprep.mubr.f32.mxu0 %v2069_v42  ;;  %v659_v49 = vpop.f32.mrf.mxu0  ;;  %v803_v54 = vpop.f32.mrf.mxu1 }
 0x163   : > { %1650 = vst [vmem:[%s3170_s10 + $0x300] sm:$0xff] %v658_v29  ;;  %1794 = vst [vmem:[%s3170_s10 + $0x780] sm:$0xff] %v802_v37  ;;  %v660_v62 = vadd.f32 %v659_v49, %v3162_v28  ;;  %v804_v3 = vadd.f32 %v803_v54, %v3162_v28  ;;  %v475_v49 = vsub.s32 2, %v3138_v2  ;;  %v483_v54 = vsub.s32 4, %v3138_v2 }
 0x165   : > { %1153 = vmatmul.mubr.f32.gmra.mxu1 %v2070_v11  ;;  %1506 = vmatmul.mubr.f32.gmra.mxu0 %v2070_v11  ;;  %1651 = vst [vmem:[%s3170_s10 + $0x308] sm:$0xff] %v660_v62  ;;  %1795 = vst [vmem:[%s3170_s10 + $0x788] sm:$0xff] %v804_v3  ;;  %v663_v17 = vpop.f32.mrf.mxu0  ;;  %v807_v27 = vpop.f32.mrf.mxu1  ;;  %v487_v11 = vsub.s32 5, %v3138_v2 }
 0x166   : > { %1158 = vmatprep.mubr.f32.mxu1 %v2071_v34  ;;  %1511 = vmatprep.mubr.f32.mxu0 %v2071_v34  ;;  %v664_v44 = vadd.f32 %v663_v17, %v3159_v22  ;;  %v808_v47 = vadd.f32 %v807_v27, %v3159_v22 }
 0x167   : > { %v665_v57 = vpop.f32.mrf.mxu0  ;;  %v809_v63 = vpop.f32.mrf.mxu1 }
 0x168   : > { %1656 = vst [vmem:[%s3170_s10 + $0x330] sm:$0xff] %v664_v44  ;;  %1800 = vst [vmem:[%s3170_s10 + $0x7b0] sm:$0xff] %v808_v47  ;;  %v666_v13 = vadd.f32 %v665_v57, %v3162_v28  ;;  %v810_v21 = vadd.f32 %v809_v63, %v3162_v28  ;;  %v3430_v44 = vrot.slane %v3149_v12, %v475_v49 }
 0x169   : > { %1159 = vmatmul.mubr.f32.gmra.mxu1 %v2072_v33  ;;  %1512 = vmatmul.mubr.f32.gmra.mxu0 %v2072_v33  ;;  %v669_v38 = vpop.f32.mrf.mxu0  ;;  %v813_v51 = vpop.f32.mrf.mxu1  ;;  %v3433_v47 = vrot.slane %v3149_v12, %v483_v54 }
 0x16a   : > { %1657 = vst [vmem:[%s3170_s10 + $0x338] sm:$0xff] %v666_v13  ;;  %1801 = vst [vmem:[%s3170_s10 + $0x7b8] sm:$0xff] %v810_v21  ;;  %1164 = vmatprep.mubr.f32.mxu1 %v2879_v35  ;;  %1517 = vmatprep.mubr.f32.mxu0 %v2073_v59  ;;  %v670_v9 = vadd.f32 %v669_v38, %v3159_v22  ;;  %v814_v20 = vadd.f32 %v813_v51, %v3159_v22 }
 0x16b   : > { %v671_v39 = vpop.f32.mrf.mxu0  ;;  %v815_v43 = vpop.f32.mrf.mxu1 }
 0x16c   : > { %1662 = vst [vmem:[%s3170_s10 + $0x360] sm:$0xff] %v670_v9  ;;  %1806 = vst [vmem:[%s3170_s10 + $0x7e0] sm:$0xff] %v814_v20  ;;  %v672_v4 = vadd.f32 %v671_v39, %v3162_v28  ;;  %v816_v16 = vadd.f32 %v815_v43, %v3162_v28 }
 0x16d   : > { %1165 = vmatmul.mubr.f32.gmra.mxu1 %v2074_v53  ;;  %1518 = vmatmul.mubr.f32.gmra.mxu0 %v2074_v53 }
 0x16e   : > { %1663 = vst [vmem:[%s3170_s10 + $0x368] sm:$0xff] %v672_v4  ;;  %1807 = vst [vmem:[%s3170_s10 + $0x7e8] sm:$0xff] %v816_v16  ;;  %1170 = vmatprep.mubr.f32.mxu1 %v2904_v52  ;;  %1523 = vmatprep.mubr.f32.mxu0 %v2904_v52  ;;  %v675_v35 = vpop.f32.mrf.mxu0  ;;  %v819_v61 = vpop.f32.mrf.mxu1 }
 0x16f   : > { %v676_v7 = vadd.f32 %v675_v35, %v3159_v22  ;;  %v820_v15 = vadd.f32 %v819_v61, %v3159_v22 }
 0x170   : > { %v677_v25 = vpop.f32.mrf.mxu0  ;;  %v821_v31 = vpop.f32.mrf.mxu1 }
 0x171   : > { %1668 = vst [vmem:[%s3170_s10 + $0x390] sm:$0xff] %v676_v7  ;;  %1812 = vst [vmem:[%s3170_s10 + $0x810] sm:$0xff] %v820_v15  ;;  %1171 = vmatmul.mubr.f32.gmra.mxu1 %v2916_v60  ;;  %1524 = vmatmul.mubr.f32.gmra.mxu0 %v2075_v32  ;;  %v678_v52 = vadd.f32 %v677_v25, %v3162_v28  ;;  %v822_v48 = vadd.f32 %v821_v31, %v3162_v28 }
 0x172   : > { %1176 = vmatprep.mubr.f32.mxu1 %v2938_v10  ;;  %1529 = vmatprep.mubr.f32.mxu0 %v2938_v10 }
 0x173   : > { %1669 = vst [vmem:[%s3170_s10 + $0x398] sm:$0xff] %v678_v52  ;;  %1813 = vst [vmem:[%s3170_s10 + $0x818] sm:$0xff] %v822_v48  ;;  %v681_v0 = vpop.f32.mrf.mxu0  ;;  %v825_v8 = vpop.f32.mrf.mxu1 }
 0x174   : > { %v682_v60 = vadd.f32 %v681_v0, %v3159_v22  ;;  %v826_v18 = vadd.f32 %v825_v8, %v3159_v22 }
 0x175   : > { %1177 = vmatmul.mubr.f32.gmra.mxu1 %v2950_v23  ;;  %1530 = vmatmul.mubr.f32.gmra.mxu0 %v2950_v23  ;;  %v683_v30 = vpop.f32.mrf.mxu0  ;;  %v827_v36 = vpop.f32.mrf.mxu1 }
 0x176   : > { %1674 = vst [vmem:[%s3170_s10 + $0x3c0] sm:$0xff] %v682_v60  ;;  %1818 = vst [vmem:[%s3170_s10 + $0x840] sm:$0xff] %v826_v18  ;;  %v684_v10 = vadd.f32 %v683_v30, %v3162_v28  ;;  %v828_v40 = vadd.f32 %v827_v36, %v3162_v28  ;;  %1182 = vmatprep.mubr.f32.mxu1 %v2972_v41  ;;  %1535 = vmatprep.mubr.f32.mxu0 %v2972_v41 }
 0x177   : > { %v687_v46 = vpop.f32.mrf.mxu0  ;;  %v831_v50 = vpop.f32.mrf.mxu1 }
 0x178   : > { %1675 = vst [vmem:[%s3170_s10 + $0x3c8] sm:$0xff] %v684_v10  ;;  %1819 = vst [vmem:[%s3170_s10 + $0x848] sm:$0xff] %v828_v40  ;;  %v688_v23 = vadd.f32 %v687_v46, %v3159_v22  ;;  %v832_v56 = vadd.f32 %v831_v50, %v3159_v22 }
 0x179   : > { %1183 = vmatmul.mubr.f32.gmra.mxu1 %v2978_v45  ;;  %1536 = vmatmul.mubr.f32.gmra.mxu0 %v2978_v45  ;;  %v689_v58 = vpop.f32.mrf.mxu0  ;;  %v833_v1 = vpop.f32.mrf.mxu1 }
 0x17a   : > { %1680 = vst [vmem:[%s3170_s10 + $0x3f0] sm:$0xff] %v688_v23  ;;  %1824 = vst [vmem:[%s3170_s10 + $0x870] sm:$0xff] %v832_v56  ;;  %v690_v41 = vadd.f32 %v689_v58, %v3162_v28  ;;  %v834_v6 = vadd.f32 %v833_v1, %v3162_v28  ;;  %1188 = vmatprep.mubr.f32.mxu1 %v3891_v14  ;;  %1541 = vmatprep.mubr.f32.mxu0 %v3891_v14 }
 0x17c   : > { %1681 = vst [vmem:[%s3170_s10 + $0x3f8] sm:$0xff] %v690_v41  ;;  %1825 = vst [vmem:[%s3170_s10 + $0x878] sm:$0xff] %v834_v6  ;;  %v693_v19 = vpop.f32.mrf.mxu0  ;;  %v837_v26 = vpop.f32.mrf.mxu1 }
 0x17d   : > { %v694_v45 = vadd.f32 %v693_v19, %v3159_v22  ;;  %v838_v29 = vadd.f32 %v837_v26, %v3159_v22  ;;  %1189 = vmatmul.mubr.f32.gmra.mxu1 %v3012_v24  ;;  %1542 = vmatmul.mubr.f32.gmra.mxu0 %v3012_v24  ;;  %v479_v24 = vsub.s32 3, %v3138_v2 }
 0x17e   : > { %v695_v37 = vpop.f32.mrf.mxu0  ;;  %v839_v42 = vpop.f32.mrf.mxu1  ;;  %1194 = vmatprep.mubr.f32.mxu1 %v3034_v55  ;;  %1547 = vmatprep.mubr.f32.mxu0 %v3034_v55 }
 0x17f   : > { %1686 = vst [vmem:[%s3170_s10 + $0x420] sm:$0xff] %v694_v45  ;;  %1830 = vst [vmem:[%s3170_s10 + $0x8a0] sm:$0xff] %v838_v29  ;;  %v696_v62 = vadd.f32 %v695_v37, %v3162_v28  ;;  %v840_v3 = vadd.f32 %v839_v42, %v3162_v28  ;;  %v3440_v13 = vrot.slane %v3149_v12, %v479_v24 }
 0x181   : > { %1687 = vst [vmem:[%s3170_s10 + $0x428] sm:$0xff] %v696_v62  ;;  %1831 = vst [vmem:[%s3170_s10 + $0x8a8] sm:$0xff] %v840_v3  ;;  %v699_v17 = vpop.f32.mrf.mxu0  ;;  %v843_v55 = vpop.f32.mrf.mxu1  ;;  %1195 = vmatmul.mubr.f32.gmra.mxu1 %v3046_v5  ;;  %1548 = vmatmul.mubr.f32.gmra.mxu0 %v3046_v5 }
 0x182   : > { %v700_v27 = vadd.f32 %v699_v17, %v3159_v22  ;;  %v844_v34 = vadd.f32 %v843_v55, %v3159_v22  ;;  %v3443_v22 = vrot.slane %v3149_v12, %v487_v11 }
 0x183   : > { %v701_v2 = vpop.f32.mrf.mxu0  ;;  %v845_v57 = vpop.f32.mrf.mxu1 }
 0x184   : > { %1692 = vst [vmem:[%s3170_s10 + $0x450] sm:$0xff] %v700_v27  ;;  %1836 = vst [vmem:[%s3170_s10 + $0x8d0] sm:$0xff] %v844_v34  ;;  %v702_v63 = vadd.f32 %v701_v2, %v3162_v28  ;;  %v846_v5 = vadd.f32 %v845_v57, %v3162_v28 }
 0x185   : > { %v914_v21 = vpop.f32.mrf.mxu1  ;;  %v1267_v33 = vpop.f32.mrf.mxu0 }
 0x186   : > { %1693 = vst [vmem:[%s3170_s10 + $0x458] sm:$0xff] %v702_v63  ;;  %1837 = vst [vmem:[%s3170_s10 + $0x8d8] sm:$0xff] %v846_v5  ;;  %v915_v38 = vadd.f32 %v914_v21, %v3430_v44  ;;  %v1268_v51 = vadd.f32 %v1267_v33, %v3433_v47 }
 0x187   : > { %v916_v59 = vpop.f32.mrf.mxu1  ;;  %v1269_v28 = vpop.f32.mrf.mxu0 }
 0x188   : > { %1556 = vst [vmem:[%s3170_s10 + $0x10] sm:$0xff] %v915_v38  ;;  %1558 = vst [vmem:[%s3170_s10 + $0x20] sm:$0xff] %v1268_v51  ;;  %v917_v9 = vadd.f32 %v916_v59, %v3440_v13  ;;  %v1270_v12 = vadd.f32 %v1269_v28, %v3443_v22 }
 0x189   : > { %v920_v20 = vpop.f32.mrf.mxu1  ;;  %v1273_v39 = vpop.f32.mrf.mxu0 }
 0x18a   : > { %1557 = vst [vmem:[%s3170_s10 + $0x18] sm:$0xff] %v917_v9  ;;  %1559 = vst [vmem:[%s3170_s10 + $0x28] sm:$0xff] %v1270_v12  ;;  %v921_v43 = vadd.f32 %v920_v20, %v3430_v44  ;;  %v1274_v4 = vadd.f32 %v1273_v39, %v3433_v47 }
 0x18b   : > { %v922_v16 = vpop.f32.mrf.mxu1  ;;  %v1275_v53 = vpop.f32.mrf.mxu0 }
 0x18c   : > { %1562 = vst [vmem:[%s3170_s10 + $0x40] sm:$0xff] %v921_v43  ;;  %1564 = vst [vmem:[%s3170_s10 + $0x50] sm:$0xff] %v1274_v4  ;;  %v923_v35 = vadd.f32 %v922_v16, %v3440_v13  ;;  %v1276_v61 = vadd.f32 %v1275_v53, %v3443_v22 }
 0x18d   : > { %v926_v7 = vpop.f32.mrf.mxu1  ;;  %v1279_v15 = vpop.f32.mrf.mxu0 }
 0x18e   : > { %1563 = vst [vmem:[%s3170_s10 + $0x48] sm:$0xff] %v923_v35  ;;  %1565 = vst [vmem:[%s3170_s10 + $0x58] sm:$0xff] %v1276_v61  ;;  %v927_v25 = vadd.f32 %v926_v7, %v3430_v44  ;;  %v1280_v31 = vadd.f32 %v1279_v15, %v3433_v47 }
 0x18f   : > { %v928_v32 = vpop.f32.mrf.mxu1  ;;  %v1281_v52 = vpop.f32.mrf.mxu0 }
 0x190   : > { %1568 = vst [vmem:[%s3170_s10 + $0x70] sm:$0xff] %v927_v25  ;;  %1570 = vst [vmem:[%s3170_s10 + $0x80] sm:$0xff] %v1280_v31  ;;  %v929_v48 = vadd.f32 %v928_v32, %v3440_v13  ;;  %v1282_v0 = vadd.f32 %v1281_v52, %v3443_v22 }
 0x191   : > { %v932_v8 = vpop.f32.mrf.mxu1  ;;  %v1285_v60 = vpop.f32.mrf.mxu0 }
 0x192   : > { %1569 = vst [vmem:[%s3170_s10 + $0x78] sm:$0xff] %v929_v48  ;;  %1571 = vst [vmem:[%s3170_s10 + $0x88] sm:$0xff] %v1282_v0  ;;  %v933_v18 = vadd.f32 %v932_v8, %v3430_v44  ;;  %v1286_v30 = vadd.f32 %v1285_v60, %v3433_v47 }
 0x193   : > { %v934_v36 = vpop.f32.mrf.mxu1  ;;  %v1287_v10 = vpop.f32.mrf.mxu0 }
 0x194   : > { %1574 = vst [vmem:[%s3170_s10 + $0xa0] sm:$0xff] %v933_v18  ;;  %1576 = vst [vmem:[%s3170_s10 + $0xb0] sm:$0xff] %v1286_v30  ;;  %v935_v40 = vadd.f32 %v934_v36, %v3440_v13  ;;  %v1288_v46 = vadd.f32 %v1287_v10, %v3443_v22 }
 0x195   : > { %v938_v50 = vpop.f32.mrf.mxu1  ;;  %v1291_v23 = vpop.f32.mrf.mxu0 }
 0x196   : > { %1575 = vst [vmem:[%s3170_s10 + $0xa8] sm:$0xff] %v935_v40  ;;  %1577 = vst [vmem:[%s3170_s10 + $0xb8] sm:$0xff] %v1288_v46  ;;  %v939_v56 = vadd.f32 %v938_v50, %v3430_v44  ;;  %v1292_v58 = vadd.f32 %v1291_v23, %v3433_v47 }
 0x197   : > { %v940_v1 = vpop.f32.mrf.mxu1  ;;  %v1293_v41 = vpop.f32.mrf.mxu0 }
 0x198   : > { %1580 = vst [vmem:[%s3170_s10 + $0xd0] sm:$0xff] %v939_v56  ;;  %1582 = vst [vmem:[%s3170_s10 + $0xe0] sm:$0xff] %v1292_v58  ;;  %v941_v6 = vadd.f32 %v940_v1, %v3440_v13  ;;  %v1294_v14 = vadd.f32 %v1293_v41, %v3443_v22 }
 0x199   : > { %v944_v19 = vpop.f32.mrf.mxu1  ;;  %v1297_v26 = vpop.f32.mrf.mxu0 }
 0x19a   : > { %1581 = vst [vmem:[%s3170_s10 + $0xd8] sm:$0xff] %v941_v6  ;;  %1583 = vst [vmem:[%s3170_s10 + $0xe8] sm:$0xff] %v1294_v14  ;;  %v945_v45 = vadd.f32 %v944_v19, %v3430_v44  ;;  %v1298_v29 = vadd.f32 %v1297_v26, %v3433_v47 }
 0x19b   : > { %v946_v37 = vpop.f32.mrf.mxu1  ;;  %v1299_v42 = vpop.f32.mrf.mxu0 }
 0x19c   : > { %1586 = vst [vmem:[%s3170_s10 + $0x100] sm:$0xff] %v945_v45  ;;  %1588 = vst [vmem:[%s3170_s10 + $0x110] sm:$0xff] %v1298_v29  ;;  %v947_v49 = vadd.f32 %v946_v37, %v3440_v13  ;;  %v1300_v54 = vadd.f32 %v1299_v42, %v3443_v22 }
 0x19d   : > { %v950_v62 = vpop.f32.mrf.mxu1  ;;  %v1303_v3 = vpop.f32.mrf.mxu0 }
 0x19e   : > { %1587 = vst [vmem:[%s3170_s10 + $0x108] sm:$0xff] %v947_v49  ;;  %1589 = vst [vmem:[%s3170_s10 + $0x118] sm:$0xff] %v1300_v54  ;;  %v951_v24 = vadd.f32 %v950_v62, %v3430_v44  ;;  %v1304_v11 = vadd.f32 %v1303_v3, %v3433_v47 }
 0x19f   : > { %v952_v17 = vpop.f32.mrf.mxu1  ;;  %v1305_v55 = vpop.f32.mrf.mxu0 }
 0x1a0   : > { %1592 = vst [vmem:[%s3170_s10 + $0x130] sm:$0xff] %v951_v24  ;;  %1594 = vst [vmem:[%s3170_s10 + $0x140] sm:$0xff] %v1304_v11  ;;  %v953_v27 = vadd.f32 %v952_v17, %v3440_v13  ;;  %v1306_v34 = vadd.f32 %v1305_v55, %v3443_v22 }
 0x1a1   : > { %v956_v2 = vpop.f32.mrf.mxu1  ;;  %v1309_v57 = vpop.f32.mrf.mxu0 }
 0x1a2   : > { %1593 = vst [vmem:[%s3170_s10 + $0x138] sm:$0xff] %v953_v27  ;;  %1595 = vst [vmem:[%s3170_s10 + $0x148] sm:$0xff] %v1306_v34  ;;  %v957_v63 = vadd.f32 %v956_v2, %v3430_v44  ;;  %v1310_v5 = vadd.f32 %v1309_v57, %v3433_v47 }
 0x1a3   : > { %v958_v21 = vpop.f32.mrf.mxu1  ;;  %v1311_v33 = vpop.f32.mrf.mxu0 }
 0x1a4   : > { %1598 = vst [vmem:[%s3170_s10 + $0x160] sm:$0xff] %v957_v63  ;;  %1600 = vst [vmem:[%s3170_s10 + $0x170] sm:$0xff] %v1310_v5  ;;  %v959_v38 = vadd.f32 %v958_v21, %v3440_v13  ;;  %v1312_v51 = vadd.f32 %v1311_v33, %v3443_v22 }
 0x1a5   : > { %v962_v59 = vpop.f32.mrf.mxu1  ;;  %v1315_v28 = vpop.f32.mrf.mxu0 }
 0x1a6   : > { %1599 = vst [vmem:[%s3170_s10 + $0x168] sm:$0xff] %v959_v38  ;;  %1601 = vst [vmem:[%s3170_s10 + $0x178] sm:$0xff] %v1312_v51  ;;  %v963_v9 = vadd.f32 %v962_v59, %v3430_v44  ;;  %v1316_v12 = vadd.f32 %v1315_v28, %v3433_v47 }
 0x1a7   : > { %v964_v20 = vpop.f32.mrf.mxu1  ;;  %v1317_v39 = vpop.f32.mrf.mxu0 }
 0x1a8   : > { %1604 = vst [vmem:[%s3170_s10 + $0x190] sm:$0xff] %v963_v9  ;;  %1606 = vst [vmem:[%s3170_s10 + $0x1a0] sm:$0xff] %v1316_v12  ;;  %v965_v43 = vadd.f32 %v964_v20, %v3440_v13  ;;  %v1318_v4 = vadd.f32 %v1317_v39, %v3443_v22 }
 0x1a9   : > { %v968_v16 = vpop.f32.mrf.mxu1  ;;  %v1321_v53 = vpop.f32.mrf.mxu0 }
 0x1aa   : > { %1605 = vst [vmem:[%s3170_s10 + $0x198] sm:$0xff] %v965_v43  ;;  %1607 = vst [vmem:[%s3170_s10 + $0x1a8] sm:$0xff] %v1318_v4  ;;  %v969_v35 = vadd.f32 %v968_v16, %v3430_v44  ;;  %v1322_v61 = vadd.f32 %v1321_v53, %v3433_v47 }
 0x1ab   : > { %v970_v7 = vpop.f32.mrf.mxu1  ;;  %v1323_v15 = vpop.f32.mrf.mxu0 }
 0x1ac   : > { %1610 = vst [vmem:[%s3170_s10 + $0x1c0] sm:$0xff] %v969_v35  ;;  %1612 = vst [vmem:[%s3170_s10 + $0x1d0] sm:$0xff] %v1322_v61  ;;  %v971_v25 = vadd.f32 %v970_v7, %v3440_v13  ;;  %v1324_v31 = vadd.f32 %v1323_v15, %v3443_v22 }
 0x1ad   : > { %v974_v32 = vpop.f32.mrf.mxu1  ;;  %v1327_v52 = vpop.f32.mrf.mxu0 }
 0x1ae   : > { %1611 = vst [vmem:[%s3170_s10 + $0x1c8] sm:$0xff] %v971_v25  ;;  %1613 = vst [vmem:[%s3170_s10 + $0x1d8] sm:$0xff] %v1324_v31  ;;  %v975_v48 = vadd.f32 %v974_v32, %v3430_v44  ;;  %v1328_v0 = vadd.f32 %v1327_v52, %v3433_v47 }
 0x1af   : > { %v976_v8 = vpop.f32.mrf.mxu1  ;;  %v1329_v60 = vpop.f32.mrf.mxu0 }
 0x1b0   : > { %1616 = vst [vmem:[%s3170_s10 + $0x1f0] sm:$0xff] %v975_v48  ;;  %1618 = vst [vmem:[%s3170_s10 + $0x200] sm:$0xff] %v1328_v0  ;;  %v977_v18 = vadd.f32 %v976_v8, %v3440_v13  ;;  %v1330_v30 = vadd.f32 %v1329_v60, %v3443_v22 }
 0x1b1   : > { %v980_v36 = vpop.f32.mrf.mxu1  ;;  %v1333_v10 = vpop.f32.mrf.mxu0 }
 0x1b2   : > { %1617 = vst [vmem:[%s3170_s10 + $0x1f8] sm:$0xff] %v977_v18  ;;  %1619 = vst [vmem:[%s3170_s10 + $0x208] sm:$0xff] %v1330_v30  ;;  %v981_v40 = vadd.f32 %v980_v36, %v3430_v44  ;;  %v1334_v46 = vadd.f32 %v1333_v10, %v3433_v47 }
 0x1b3   : > { %v982_v50 = vpop.f32.mrf.mxu1  ;;  %v1335_v23 = vpop.f32.mrf.mxu0 }
 0x1b4   : > { %1622 = vst [vmem:[%s3170_s10 + $0x220] sm:$0xff] %v981_v40  ;;  %1624 = vst [vmem:[%s3170_s10 + $0x230] sm:$0xff] %v1334_v46  ;;  %v983_v56 = vadd.f32 %v982_v50, %v3440_v13  ;;  %v1336_v58 = vadd.f32 %v1335_v23, %v3443_v22 }
 0x1b5   : > { %v986_v1 = vpop.f32.mrf.mxu1  ;;  %v1339_v41 = vpop.f32.mrf.mxu0 }
 0x1b6   : > { %1623 = vst [vmem:[%s3170_s10 + $0x228] sm:$0xff] %v983_v56  ;;  %1625 = vst [vmem:[%s3170_s10 + $0x238] sm:$0xff] %v1336_v58  ;;  %v987_v6 = vadd.f32 %v986_v1, %v3430_v44  ;;  %v1340_v14 = vadd.f32 %v1339_v41, %v3433_v47 }
 0x1b7   : > { %v988_v19 = vpop.f32.mrf.mxu1  ;;  %v1341_v26 = vpop.f32.mrf.mxu0 }
 0x1b8   : > { %1628 = vst [vmem:[%s3170_s10 + $0x250] sm:$0xff] %v987_v6  ;;  %1630 = vst [vmem:[%s3170_s10 + $0x260] sm:$0xff] %v1340_v14  ;;  %v989_v45 = vadd.f32 %v988_v19, %v3440_v13  ;;  %v1342_v29 = vadd.f32 %v1341_v26, %v3443_v22 }
 0x1b9   : > { %v992_v37 = vpop.f32.mrf.mxu1  ;;  %v1345_v42 = vpop.f32.mrf.mxu0 }
 0x1ba   : > { %1629 = vst [vmem:[%s3170_s10 + $0x258] sm:$0xff] %v989_v45  ;;  %1631 = vst [vmem:[%s3170_s10 + $0x268] sm:$0xff] %v1342_v29  ;;  %v993_v49 = vadd.f32 %v992_v37, %v3430_v44  ;;  %v1346_v54 = vadd.f32 %v1345_v42, %v3433_v47 }
 0x1bb   : > { %v994_v62 = vpop.f32.mrf.mxu1  ;;  %v1347_v3 = vpop.f32.mrf.mxu0 }
 0x1bc   : > { %1634 = vst [vmem:[%s3170_s10 + $0x280] sm:$0xff] %v993_v49  ;;  %1636 = vst [vmem:[%s3170_s10 + $0x290] sm:$0xff] %v1346_v54  ;;  %v995_v24 = vadd.f32 %v994_v62, %v3440_v13  ;;  %v1348_v11 = vadd.f32 %v1347_v3, %v3443_v22 }
 0x1bd   : > { %v998_v17 = vpop.f32.mrf.mxu1  ;;  %v1351_v55 = vpop.f32.mrf.mxu0 }
 0x1be   : > { %1635 = vst [vmem:[%s3170_s10 + $0x288] sm:$0xff] %v995_v24  ;;  %1637 = vst [vmem:[%s3170_s10 + $0x298] sm:$0xff] %v1348_v11  ;;  %v999_v27 = vadd.f32 %v998_v17, %v3430_v44  ;;  %v1352_v34 = vadd.f32 %v1351_v55, %v3433_v47 }
 0x1bf   : > { %v1000_v2 = vpop.f32.mrf.mxu1  ;;  %v1353_v57 = vpop.f32.mrf.mxu0 }
 0x1c0   : > { %1640 = vst [vmem:[%s3170_s10 + $0x2b0] sm:$0xff] %v999_v27  ;;  %1642 = vst [vmem:[%s3170_s10 + $0x2c0] sm:$0xff] %v1352_v34  ;;  %v1001_v63 = vadd.f32 %v1000_v2, %v3440_v13  ;;  %v1354_v5 = vadd.f32 %v1353_v57, %v3443_v22 }
 0x1c1   : > { %v1004_v21 = vpop.f32.mrf.mxu1  ;;  %v1357_v33 = vpop.f32.mrf.mxu0 }
 0x1c2   : > { %1641 = vst [vmem:[%s3170_s10 + $0x2b8] sm:$0xff] %v1001_v63  ;;  %1643 = vst [vmem:[%s3170_s10 + $0x2c8] sm:$0xff] %v1354_v5  ;;  %v1005_v38 = vadd.f32 %v1004_v21, %v3430_v44  ;;  %v1358_v51 = vadd.f32 %v1357_v33, %v3433_v47 }
 0x1c3   : > { %v1006_v59 = vpop.f32.mrf.mxu1  ;;  %v1359_v28 = vpop.f32.mrf.mxu0 }
 0x1c4   : > { %1646 = vst [vmem:[%s3170_s10 + $0x2e0] sm:$0xff] %v1005_v38  ;;  %1648 = vst [vmem:[%s3170_s10 + $0x2f0] sm:$0xff] %v1358_v51  ;;  %v1007_v9 = vadd.f32 %v1006_v59, %v3440_v13  ;;  %v1360_v12 = vadd.f32 %v1359_v28, %v3443_v22 }
 0x1c5   : > { %v1010_v20 = vpop.f32.mrf.mxu1  ;;  %v1363_v39 = vpop.f32.mrf.mxu0 }
 0x1c6   : > { %1647 = vst [vmem:[%s3170_s10 + $0x2e8] sm:$0xff] %v1007_v9  ;;  %1649 = vst [vmem:[%s3170_s10 + $0x2f8] sm:$0xff] %v1360_v12  ;;  %v1011_v43 = vadd.f32 %v1010_v20, %v3430_v44  ;;  %v1364_v4 = vadd.f32 %v1363_v39, %v3433_v47 }
 0x1c7   : > { %v1012_v16 = vpop.f32.mrf.mxu1  ;;  %v1365_v53 = vpop.f32.mrf.mxu0 }
 0x1c8   : > { %1652 = vst [vmem:[%s3170_s10 + $0x310] sm:$0xff] %v1011_v43  ;;  %1654 = vst [vmem:[%s3170_s10 + $0x320] sm:$0xff] %v1364_v4  ;;  %v1013_v35 = vadd.f32 %v1012_v16, %v3440_v13  ;;  %v1366_v61 = vadd.f32 %v1365_v53, %v3443_v22 }
 0x1c9   : > { %v1016_v7 = vpop.f32.mrf.mxu1  ;;  %v1369_v15 = vpop.f32.mrf.mxu0 }
 0x1ca   : > { %1653 = vst [vmem:[%s3170_s10 + $0x318] sm:$0xff] %v1013_v35  ;;  %1655 = vst [vmem:[%s3170_s10 + $0x328] sm:$0xff] %v1366_v61  ;;  %v1017_v25 = vadd.f32 %v1016_v7, %v3430_v44  ;;  %v1370_v31 = vadd.f32 %v1369_v15, %v3433_v47 }
 0x1cb   : > { %v1018_v32 = vpop.f32.mrf.mxu1  ;;  %v1371_v52 = vpop.f32.mrf.mxu0 }
 0x1cc   : > { %1658 = vst [vmem:[%s3170_s10 + $0x340] sm:$0xff] %v1017_v25  ;;  %1660 = vst [vmem:[%s3170_s10 + $0x350] sm:$0xff] %v1370_v31  ;;  %v1019_v48 = vadd.f32 %v1018_v32, %v3440_v13  ;;  %v1372_v0 = vadd.f32 %v1371_v52, %v3443_v22 }
 0x1cd   : > { %v1022_v8 = vpop.f32.mrf.mxu1  ;;  %v1375_v60 = vpop.f32.mrf.mxu0 }
 0x1ce   : > { %1659 = vst [vmem:[%s3170_s10 + $0x348] sm:$0xff] %v1019_v48  ;;  %1661 = vst [vmem:[%s3170_s10 + $0x358] sm:$0xff] %v1372_v0  ;;  %v1023_v18 = vadd.f32 %v1022_v8, %v3430_v44  ;;  %v1376_v30 = vadd.f32 %v1375_v60, %v3433_v47 }
 0x1cf   : > { %v1024_v36 = vpop.f32.mrf.mxu1  ;;  %v1377_v10 = vpop.f32.mrf.mxu0 }
 0x1d0   : > { %1664 = vst [vmem:[%s3170_s10 + $0x370] sm:$0xff] %v1023_v18  ;;  %1666 = vst [vmem:[%s3170_s10 + $0x380] sm:$0xff] %v1376_v30  ;;  %v1025_v40 = vadd.f32 %v1024_v36, %v3440_v13  ;;  %v1378_v46 = vadd.f32 %v1377_v10, %v3443_v22 }
 0x1d1   : > { %v1028_v50 = vpop.f32.mrf.mxu1  ;;  %v1381_v23 = vpop.f32.mrf.mxu0 }
 0x1d2   : > { %1665 = vst [vmem:[%s3170_s10 + $0x378] sm:$0xff] %v1025_v40  ;;  %1667 = vst [vmem:[%s3170_s10 + $0x388] sm:$0xff] %v1378_v46  ;;  %v1029_v56 = vadd.f32 %v1028_v50, %v3430_v44  ;;  %v1382_v58 = vadd.f32 %v1381_v23, %v3433_v47 }
 0x1d3   : > { %v1030_v1 = vpop.f32.mrf.mxu1  ;;  %v1383_v41 = vpop.f32.mrf.mxu0 }
 0x1d4   : > { %1670 = vst [vmem:[%s3170_s10 + $0x3a0] sm:$0xff] %v1029_v56  ;;  %1672 = vst [vmem:[%s3170_s10 + $0x3b0] sm:$0xff] %v1382_v58  ;;  %v1031_v6 = vadd.f32 %v1030_v1, %v3440_v13  ;;  %v1384_v14 = vadd.f32 %v1383_v41, %v3443_v22 }
 0x1d5   : > { %v1034_v19 = vpop.f32.mrf.mxu1  ;;  %v1387_v26 = vpop.f32.mrf.mxu0 }
 0x1d6   : > { %1671 = vst [vmem:[%s3170_s10 + $0x3a8] sm:$0xff] %v1031_v6  ;;  %1673 = vst [vmem:[%s3170_s10 + $0x3b8] sm:$0xff] %v1384_v14  ;;  %v1035_v45 = vadd.f32 %v1034_v19, %v3430_v44  ;;  %v1388_v29 = vadd.f32 %v1387_v26, %v3433_v47 }
 0x1d7   : > { %v1036_v37 = vpop.f32.mrf.mxu1  ;;  %v1389_v42 = vpop.f32.mrf.mxu0 }
 0x1d8   : > { %1676 = vst [vmem:[%s3170_s10 + $0x3d0] sm:$0xff] %v1035_v45  ;;  %1678 = vst [vmem:[%s3170_s10 + $0x3e0] sm:$0xff] %v1388_v29  ;;  %v1037_v49 = vadd.f32 %v1036_v37, %v3440_v13  ;;  %v1390_v54 = vadd.f32 %v1389_v42, %v3443_v22 }
 0x1d9   : > { %v1040_v62 = vpop.f32.mrf.mxu1  ;;  %v1393_v3 = vpop.f32.mrf.mxu0 }
 0x1da   : > { %1677 = vst [vmem:[%s3170_s10 + $0x3d8] sm:$0xff] %v1037_v49  ;;  %1679 = vst [vmem:[%s3170_s10 + $0x3e8] sm:$0xff] %v1390_v54  ;;  %v1041_v24 = vadd.f32 %v1040_v62, %v3430_v44  ;;  %v1394_v11 = vadd.f32 %v1393_v3, %v3433_v47 }
 0x1db   : > { %v1042_v17 = vpop.f32.mrf.mxu1  ;;  %v1395_v55 = vpop.f32.mrf.mxu0 }
 0x1dc   : > { %1682 = vst [vmem:[%s3170_s10 + $0x400] sm:$0xff] %v1041_v24  ;;  %1684 = vst [vmem:[%s3170_s10 + $0x410] sm:$0xff] %v1394_v11  ;;  %v1043_v27 = vadd.f32 %v1042_v17, %v3440_v13  ;;  %v1396_v34 = vadd.f32 %v1395_v55, %v3443_v22 }
 0x1dd   : > { %v1046_v2 = vpop.f32.mrf.mxu1  ;;  %v1399_v57 = vpop.f32.mrf.mxu0 }
 0x1de   : > { %1683 = vst [vmem:[%s3170_s10 + $0x408] sm:$0xff] %v1043_v27  ;;  %1685 = vst [vmem:[%s3170_s10 + $0x418] sm:$0xff] %v1396_v34  ;;  %v1047_v63 = vadd.f32 %v1046_v2, %v3430_v44  ;;  %v1400_v5 = vadd.f32 %v1399_v57, %v3433_v47 }
 0x1df   : > { %v1048_v21 = vpop.f32.mrf.mxu1  ;;  %v1401_v33 = vpop.f32.mrf.mxu0 }
 0x1e0   : > { %1688 = vst [vmem:[%s3170_s10 + $0x430] sm:$0xff] %v1047_v63  ;;  %1690 = vst [vmem:[%s3170_s10 + $0x440] sm:$0xff] %v1400_v5  ;;  %v1049_v38 = vadd.f32 %v1048_v21, %v3440_v13  ;;  %v1402_v51 = vadd.f32 %v1401_v33, %v3443_v22 }
 0x1e1   : > { %v1052_v59 = vpop.f32.mrf.mxu1  ;;  %v1405_v28 = vpop.f32.mrf.mxu0 }
 0x1e2   : > { %1689 = vst [vmem:[%s3170_s10 + $0x438] sm:$0xff] %v1049_v38  ;;  %1691 = vst [vmem:[%s3170_s10 + $0x448] sm:$0xff] %v1402_v51  ;;  %v1053_v9 = vadd.f32 %v1052_v59, %v3430_v44  ;;  %v1406_v12 = vadd.f32 %v1405_v28, %v3433_v47 }
 0x1e3   : > { %v1054_v20 = vpop.f32.mrf.mxu1  ;;  %v1407_v39 = vpop.f32.mrf.mxu0 }
 0x1e4   : > { %1694 = vst [vmem:[%s3170_s10 + $0x460] sm:$0xff] %v1053_v9  ;;  %1696 = vst [vmem:[%s3170_s10 + $0x470] sm:$0xff] %v1406_v12  ;;  %v1055_v43 = vadd.f32 %v1054_v20, %v3440_v13  ;;  %v1408_v4 = vadd.f32 %v1407_v39, %v3443_v22 }
 0x1e5   : > { %v1058_v16 = vpop.f32.mrf.mxu1  ;;  %v1411_v53 = vpop.f32.mrf.mxu0 }
 0x1e6   : > { %1695 = vst [vmem:[%s3170_s10 + $0x468] sm:$0xff] %v1055_v43  ;;  %1697 = vst [vmem:[%s3170_s10 + $0x478] sm:$0xff] %v1408_v4  ;;  %v1059_v35 = vadd.f32 %v1058_v16, %v3430_v44  ;;  %v1412_v61 = vadd.f32 %v1411_v53, %v3433_v47 }
 0x1e7   : > { %v1060_v7 = vpop.f32.mrf.mxu1  ;;  %v1413_v15 = vpop.f32.mrf.mxu0 }
 0x1e8   : > { %1700 = vst [vmem:[%s3170_s10 + $0x490] sm:$0xff] %v1059_v35  ;;  %1702 = vst [vmem:[%s3170_s10 + $0x4a0] sm:$0xff] %v1412_v61  ;;  %v1061_v25 = vadd.f32 %v1060_v7, %v3440_v13  ;;  %v1414_v31 = vadd.f32 %v1413_v15, %v3443_v22 }
 0x1e9   : > { %v1064_v32 = vpop.f32.mrf.mxu1  ;;  %v1417_v52 = vpop.f32.mrf.mxu0 }
 0x1ea   : > { %1701 = vst [vmem:[%s3170_s10 + $0x498] sm:$0xff] %v1061_v25  ;;  %1703 = vst [vmem:[%s3170_s10 + $0x4a8] sm:$0xff] %v1414_v31  ;;  %v1065_v48 = vadd.f32 %v1064_v32, %v3430_v44  ;;  %v1418_v0 = vadd.f32 %v1417_v52, %v3433_v47 }
 0x1eb   : > { %v1066_v8 = vpop.f32.mrf.mxu1  ;;  %v1419_v60 = vpop.f32.mrf.mxu0 }
 0x1ec   : > { %1706 = vst [vmem:[%s3170_s10 + $0x4c0] sm:$0xff] %v1065_v48  ;;  %1708 = vst [vmem:[%s3170_s10 + $0x4d0] sm:$0xff] %v1418_v0  ;;  %v1067_v18 = vadd.f32 %v1066_v8, %v3440_v13  ;;  %v1420_v30 = vadd.f32 %v1419_v60, %v3443_v22 }
 0x1ed   : > { %v1070_v36 = vpop.f32.mrf.mxu1  ;;  %v1423_v10 = vpop.f32.mrf.mxu0 }
 0x1ee   : > { %1707 = vst [vmem:[%s3170_s10 + $0x4c8] sm:$0xff] %v1067_v18  ;;  %1709 = vst [vmem:[%s3170_s10 + $0x4d8] sm:$0xff] %v1420_v30  ;;  %v1071_v40 = vadd.f32 %v1070_v36, %v3430_v44  ;;  %v1424_v46 = vadd.f32 %v1423_v10, %v3433_v47 }
 0x1ef   : > { %v1072_v50 = vpop.f32.mrf.mxu1  ;;  %v1425_v23 = vpop.f32.mrf.mxu0 }
 0x1f0   : > { %1712 = vst [vmem:[%s3170_s10 + $0x4f0] sm:$0xff] %v1071_v40  ;;  %1714 = vst [vmem:[%s3170_s10 + $0x500] sm:$0xff] %v1424_v46  ;;  %v1073_v56 = vadd.f32 %v1072_v50, %v3440_v13  ;;  %v1426_v58 = vadd.f32 %v1425_v23, %v3443_v22 }
 0x1f1   : > { %v1076_v1 = vpop.f32.mrf.mxu1  ;;  %v1429_v41 = vpop.f32.mrf.mxu0 }
 0x1f2   : > { %1713 = vst [vmem:[%s3170_s10 + $0x4f8] sm:$0xff] %v1073_v56  ;;  %1715 = vst [vmem:[%s3170_s10 + $0x508] sm:$0xff] %v1426_v58  ;;  %v1077_v6 = vadd.f32 %v1076_v1, %v3430_v44  ;;  %v1430_v14 = vadd.f32 %v1429_v41, %v3433_v47 }
 0x1f3   : > { %v1078_v19 = vpop.f32.mrf.mxu1  ;;  %v1431_v26 = vpop.f32.mrf.mxu0 }
 0x1f4   : > { %1718 = vst [vmem:[%s3170_s10 + $0x520] sm:$0xff] %v1077_v6  ;;  %1720 = vst [vmem:[%s3170_s10 + $0x530] sm:$0xff] %v1430_v14  ;;  %v1079_v45 = vadd.f32 %v1078_v19, %v3440_v13  ;;  %v1432_v29 = vadd.f32 %v1431_v26, %v3443_v22 }
 0x1f5   : > { %v1082_v37 = vpop.f32.mrf.mxu1  ;;  %v1435_v42 = vpop.f32.mrf.mxu0 }
 0x1f6   : > { %1719 = vst [vmem:[%s3170_s10 + $0x528] sm:$0xff] %v1079_v45  ;;  %1721 = vst [vmem:[%s3170_s10 + $0x538] sm:$0xff] %v1432_v29  ;;  %v1083_v49 = vadd.f32 %v1082_v37, %v3430_v44  ;;  %v1436_v54 = vadd.f32 %v1435_v42, %v3433_v47 }
 0x1f7   : > { %v1084_v62 = vpop.f32.mrf.mxu1  ;;  %v1437_v3 = vpop.f32.mrf.mxu0 }
 0x1f8   : > { %1724 = vst [vmem:[%s3170_s10 + $0x550] sm:$0xff] %v1083_v49  ;;  %1726 = vst [vmem:[%s3170_s10 + $0x560] sm:$0xff] %v1436_v54  ;;  %v1085_v24 = vadd.f32 %v1084_v62, %v3440_v13  ;;  %v1438_v11 = vadd.f32 %v1437_v3, %v3443_v22 }
 0x1f9   : > { %v1088_v17 = vpop.f32.mrf.mxu1  ;;  %v1441_v55 = vpop.f32.mrf.mxu0 }
 0x1fa   : > { %1725 = vst [vmem:[%s3170_s10 + $0x558] sm:$0xff] %v1085_v24  ;;  %1727 = vst [vmem:[%s3170_s10 + $0x568] sm:$0xff] %v1438_v11  ;;  %v1089_v27 = vadd.f32 %v1088_v17, %v3430_v44  ;;  %v1442_v34 = vadd.f32 %v1441_v55, %v3433_v47 }
 0x1fb   : > { %v1090_v2 = vpop.f32.mrf.mxu1  ;;  %v1443_v57 = vpop.f32.mrf.mxu0 }
 0x1fc   : > { %1730 = vst [vmem:[%s3170_s10 + $0x580] sm:$0xff] %v1089_v27  ;;  %1732 = vst [vmem:[%s3170_s10 + $0x590] sm:$0xff] %v1442_v34  ;;  %v1091_v63 = vadd.f32 %v1090_v2, %v3440_v13  ;;  %v1444_v5 = vadd.f32 %v1443_v57, %v3443_v22 }
 0x1fd   : > { %v1094_v21 = vpop.f32.mrf.mxu1  ;;  %v1447_v33 = vpop.f32.mrf.mxu0 }
 0x1fe   : > { %1731 = vst [vmem:[%s3170_s10 + $0x588] sm:$0xff] %v1091_v63  ;;  %1733 = vst [vmem:[%s3170_s10 + $0x598] sm:$0xff] %v1444_v5  ;;  %v1095_v38 = vadd.f32 %v1094_v21, %v3430_v44  ;;  %v1448_v51 = vadd.f32 %v1447_v33, %v3433_v47 }
 0x1ff   : > { %v1096_v59 = vpop.f32.mrf.mxu1  ;;  %v1449_v28 = vpop.f32.mrf.mxu0 }
 0x200   : > { %1736 = vst [vmem:[%s3170_s10 + $0x5b0] sm:$0xff] %v1095_v38  ;;  %1738 = vst [vmem:[%s3170_s10 + $0x5c0] sm:$0xff] %v1448_v51  ;;  %v1097_v9 = vadd.f32 %v1096_v59, %v3440_v13  ;;  %v1450_v12 = vadd.f32 %v1449_v28, %v3443_v22 }
 0x201   : > { %v1100_v20 = vpop.f32.mrf.mxu1  ;;  %v1453_v39 = vpop.f32.mrf.mxu0 }
 0x202   : > { %1737 = vst [vmem:[%s3170_s10 + $0x5b8] sm:$0xff] %v1097_v9  ;;  %1739 = vst [vmem:[%s3170_s10 + $0x5c8] sm:$0xff] %v1450_v12  ;;  %v1101_v43 = vadd.f32 %v1100_v20, %v3430_v44  ;;  %v1454_v4 = vadd.f32 %v1453_v39, %v3433_v47 }
 0x203   : > { %v1102_v16 = vpop.f32.mrf.mxu1  ;;  %v1455_v53 = vpop.f32.mrf.mxu0 }
 0x204   : > { %1742 = vst [vmem:[%s3170_s10 + $0x5e0] sm:$0xff] %v1101_v43  ;;  %1744 = vst [vmem:[%s3170_s10 + $0x5f0] sm:$0xff] %v1454_v4  ;;  %v1103_v35 = vadd.f32 %v1102_v16, %v3440_v13  ;;  %v1456_v61 = vadd.f32 %v1455_v53, %v3443_v22 }
 0x205   : > { %v1106_v7 = vpop.f32.mrf.mxu1  ;;  %v1459_v15 = vpop.f32.mrf.mxu0 }
 0x206   : > { %1743 = vst [vmem:[%s3170_s10 + $0x5e8] sm:$0xff] %v1103_v35  ;;  %1745 = vst [vmem:[%s3170_s10 + $0x5f8] sm:$0xff] %v1456_v61  ;;  %v1107_v25 = vadd.f32 %v1106_v7, %v3430_v44  ;;  %v1460_v31 = vadd.f32 %v1459_v15, %v3433_v47 }
 0x207   : > { %v1108_v32 = vpop.f32.mrf.mxu1  ;;  %v1461_v52 = vpop.f32.mrf.mxu0 }
 0x208   : > { %1748 = vst [vmem:[%s3170_s10 + $0x610] sm:$0xff] %v1107_v25  ;;  %1750 = vst [vmem:[%s3170_s10 + $0x620] sm:$0xff] %v1460_v31  ;;  %v1109_v48 = vadd.f32 %v1108_v32, %v3440_v13  ;;  %v1462_v0 = vadd.f32 %v1461_v52, %v3443_v22 }
 0x209   : > { %v1112_v8 = vpop.f32.mrf.mxu1  ;;  %v1465_v60 = vpop.f32.mrf.mxu0 }
 0x20a   : > { %1749 = vst [vmem:[%s3170_s10 + $0x618] sm:$0xff] %v1109_v48  ;;  %1751 = vst [vmem:[%s3170_s10 + $0x628] sm:$0xff] %v1462_v0  ;;  %v1113_v18 = vadd.f32 %v1112_v8, %v3430_v44  ;;  %v1466_v30 = vadd.f32 %v1465_v60, %v3433_v47 }
 0x20b   : > { %v1114_v36 = vpop.f32.mrf.mxu1  ;;  %v1467_v10 = vpop.f32.mrf.mxu0 }
 0x20c   : > { %1754 = vst [vmem:[%s3170_s10 + $0x640] sm:$0xff] %v1113_v18  ;;  %1756 = vst [vmem:[%s3170_s10 + $0x650] sm:$0xff] %v1466_v30  ;;  %v1115_v40 = vadd.f32 %v1114_v36, %v3440_v13  ;;  %v1468_v46 = vadd.f32 %v1467_v10, %v3443_v22 }
 0x20d   : > { %v1118_v50 = vpop.f32.mrf.mxu1  ;;  %v1471_v23 = vpop.f32.mrf.mxu0 }
 0x20e   : > { %1755 = vst [vmem:[%s3170_s10 + $0x648] sm:$0xff] %v1115_v40  ;;  %1757 = vst [vmem:[%s3170_s10 + $0x658] sm:$0xff] %v1468_v46  ;;  %v1119_v56 = vadd.f32 %v1118_v50, %v3430_v44  ;;  %v1472_v58 = vadd.f32 %v1471_v23, %v3433_v47 }
 0x20f   : > { %v1120_v1 = vpop.f32.mrf.mxu1  ;;  %v1473_v41 = vpop.f32.mrf.mxu0 }
 0x210   : > { %1760 = vst [vmem:[%s3170_s10 + $0x670] sm:$0xff] %v1119_v56  ;;  %1762 = vst [vmem:[%s3170_s10 + $0x680] sm:$0xff] %v1472_v58  ;;  %v1121_v6 = vadd.f32 %v1120_v1, %v3440_v13  ;;  %v1474_v14 = vadd.f32 %v1473_v41, %v3443_v22 }
 0x211   : > { %v1124_v19 = vpop.f32.mrf.mxu1  ;;  %v1477_v26 = vpop.f32.mrf.mxu0 }
 0x212   : > { %1761 = vst [vmem:[%s3170_s10 + $0x678] sm:$0xff] %v1121_v6  ;;  %1763 = vst [vmem:[%s3170_s10 + $0x688] sm:$0xff] %v1474_v14  ;;  %v1125_v45 = vadd.f32 %v1124_v19, %v3430_v44  ;;  %v1478_v29 = vadd.f32 %v1477_v26, %v3433_v47 }
 0x213   : > { %v1126_v37 = vpop.f32.mrf.mxu1  ;;  %v1479_v42 = vpop.f32.mrf.mxu0 }
 0x214   : > { %1766 = vst [vmem:[%s3170_s10 + $0x6a0] sm:$0xff] %v1125_v45  ;;  %1768 = vst [vmem:[%s3170_s10 + $0x6b0] sm:$0xff] %v1478_v29  ;;  %v1127_v49 = vadd.f32 %v1126_v37, %v3440_v13  ;;  %v1480_v54 = vadd.f32 %v1479_v42, %v3443_v22 }
 0x215   : > { %v1130_v62 = vpop.f32.mrf.mxu1  ;;  %v1483_v3 = vpop.f32.mrf.mxu0 }
 0x216   : > { %1767 = vst [vmem:[%s3170_s10 + $0x6a8] sm:$0xff] %v1127_v49  ;;  %1769 = vst [vmem:[%s3170_s10 + $0x6b8] sm:$0xff] %v1480_v54  ;;  %v1131_v24 = vadd.f32 %v1130_v62, %v3430_v44  ;;  %v1484_v11 = vadd.f32 %v1483_v3, %v3433_v47 }
 0x217   : > { %v1132_v17 = vpop.f32.mrf.mxu1  ;;  %v1485_v55 = vpop.f32.mrf.mxu0 }
 0x218   : > { %1772 = vst [vmem:[%s3170_s10 + $0x6d0] sm:$0xff] %v1131_v24  ;;  %1774 = vst [vmem:[%s3170_s10 + $0x6e0] sm:$0xff] %v1484_v11  ;;  %v1133_v27 = vadd.f32 %v1132_v17, %v3440_v13  ;;  %v1486_v34 = vadd.f32 %v1485_v55, %v3443_v22 }
 0x219   : > { %v1136_v2 = vpop.f32.mrf.mxu1  ;;  %v1489_v57 = vpop.f32.mrf.mxu0 }
 0x21a   : > { %1773 = vst [vmem:[%s3170_s10 + $0x6d8] sm:$0xff] %v1133_v27  ;;  %1775 = vst [vmem:[%s3170_s10 + $0x6e8] sm:$0xff] %v1486_v34  ;;  %v1137_v63 = vadd.f32 %v1136_v2, %v3430_v44  ;;  %v1490_v5 = vadd.f32 %v1489_v57, %v3433_v47 }
 0x21b   : > { %v1138_v21 = vpop.f32.mrf.mxu1  ;;  %v1491_v33 = vpop.f32.mrf.mxu0 }
 0x21c   : > { %1778 = vst [vmem:[%s3170_s10 + $0x700] sm:$0xff] %v1137_v63  ;;  %1780 = vst [vmem:[%s3170_s10 + $0x710] sm:$0xff] %v1490_v5  ;;  %v1139_v38 = vadd.f32 %v1138_v21, %v3440_v13  ;;  %v1492_v51 = vadd.f32 %v1491_v33, %v3443_v22 }
 0x21d   : > { %v1142_v59 = vpop.f32.mrf.mxu1  ;;  %v1495_v28 = vpop.f32.mrf.mxu0 }
 0x21e   : > { %1779 = vst [vmem:[%s3170_s10 + $0x708] sm:$0xff] %v1139_v38  ;;  %1781 = vst [vmem:[%s3170_s10 + $0x718] sm:$0xff] %v1492_v51  ;;  %v1143_v9 = vadd.f32 %v1142_v59, %v3430_v44  ;;  %v1496_v12 = vadd.f32 %v1495_v28, %v3433_v47 }
 0x21f   : > { %v1144_v20 = vpop.f32.mrf.mxu1  ;;  %v1497_v39 = vpop.f32.mrf.mxu0 }
 0x220   : > { %1784 = vst [vmem:[%s3170_s10 + $0x730] sm:$0xff] %v1143_v9  ;;  %1786 = vst [vmem:[%s3170_s10 + $0x740] sm:$0xff] %v1496_v12  ;;  %v1145_v43 = vadd.f32 %v1144_v20, %v3440_v13  ;;  %v1498_v4 = vadd.f32 %v1497_v39, %v3443_v22 }
 0x221   : > { %v1148_v16 = vpop.f32.mrf.mxu1  ;;  %v1501_v53 = vpop.f32.mrf.mxu0 }
 0x222   : > { %1785 = vst [vmem:[%s3170_s10 + $0x738] sm:$0xff] %v1145_v43  ;;  %1787 = vst [vmem:[%s3170_s10 + $0x748] sm:$0xff] %v1498_v4  ;;  %v1149_v35 = vadd.f32 %v1148_v16, %v3430_v44  ;;  %v1502_v61 = vadd.f32 %v1501_v53, %v3433_v47 }
 0x223   : > { %v1150_v7 = vpop.f32.mrf.mxu1  ;;  %v1503_v15 = vpop.f32.mrf.mxu0 }
 0x224   : > { %1790 = vst [vmem:[%s3170_s10 + $0x760] sm:$0xff] %v1149_v35  ;;  %1792 = vst [vmem:[%s3170_s10 + $0x770] sm:$0xff] %v1502_v61  ;;  %v1151_v25 = vadd.f32 %v1150_v7, %v3440_v13  ;;  %v1504_v31 = vadd.f32 %v1503_v15, %v3443_v22 }
 0x225   : > { %v1154_v32 = vpop.f32.mrf.mxu1  ;;  %v1507_v52 = vpop.f32.mrf.mxu0 }
 0x226   : > { %1791 = vst [vmem:[%s3170_s10 + $0x768] sm:$0xff] %v1151_v25  ;;  %1793 = vst [vmem:[%s3170_s10 + $0x778] sm:$0xff] %v1504_v31  ;;  %v1155_v48 = vadd.f32 %v1154_v32, %v3430_v44  ;;  %v1508_v0 = vadd.f32 %v1507_v52, %v3433_v47 }
 0x227   : > { %v1156_v8 = vpop.f32.mrf.mxu1  ;;  %v1509_v60 = vpop.f32.mrf.mxu0 }
 0x228   : > { %1796 = vst [vmem:[%s3170_s10 + $0x790] sm:$0xff] %v1155_v48  ;;  %1798 = vst [vmem:[%s3170_s10 + $0x7a0] sm:$0xff] %v1508_v0  ;;  %v1157_v18 = vadd.f32 %v1156_v8, %v3440_v13  ;;  %v1510_v30 = vadd.f32 %v1509_v60, %v3443_v22 }
 0x229   : > { %v1160_v36 = vpop.f32.mrf.mxu1  ;;  %v1513_v10 = vpop.f32.mrf.mxu0 }
 0x22a   : > { %1797 = vst [vmem:[%s3170_s10 + $0x798] sm:$0xff] %v1157_v18  ;;  %1799 = vst [vmem:[%s3170_s10 + $0x7a8] sm:$0xff] %v1510_v30  ;;  %v1161_v40 = vadd.f32 %v1160_v36, %v3430_v44  ;;  %v1514_v46 = vadd.f32 %v1513_v10, %v3433_v47 }
 0x22b   : > { %v1162_v50 = vpop.f32.mrf.mxu1  ;;  %v1515_v23 = vpop.f32.mrf.mxu0 }
 0x22c   : > { %1802 = vst [vmem:[%s3170_s10 + $0x7c0] sm:$0xff] %v1161_v40  ;;  %1804 = vst [vmem:[%s3170_s10 + $0x7d0] sm:$0xff] %v1514_v46  ;;  %v1163_v56 = vadd.f32 %v1162_v50, %v3440_v13  ;;  %v1516_v58 = vadd.f32 %v1515_v23, %v3443_v22 }
 0x22d   : > { %v1166_v1 = vpop.f32.mrf.mxu1  ;;  %v1519_v41 = vpop.f32.mrf.mxu0 }
 0x22e   : > { %1803 = vst [vmem:[%s3170_s10 + $0x7c8] sm:$0xff] %v1163_v56  ;;  %1805 = vst [vmem:[%s3170_s10 + $0x7d8] sm:$0xff] %v1516_v58  ;;  %v1167_v6 = vadd.f32 %v1166_v1, %v3430_v44  ;;  %v1520_v14 = vadd.f32 %v1519_v41, %v3433_v47 }
 0x22f   : > { %v1168_v19 = vpop.f32.mrf.mxu1  ;;  %v1521_v26 = vpop.f32.mrf.mxu0 }
 0x230   : > { %1808 = vst [vmem:[%s3170_s10 + $0x7f0] sm:$0xff] %v1167_v6  ;;  %1810 = vst [vmem:[%s3170_s10 + $0x800] sm:$0xff] %v1520_v14  ;;  %v1169_v45 = vadd.f32 %v1168_v19, %v3440_v13  ;;  %v1522_v29 = vadd.f32 %v1521_v26, %v3443_v22 }
 0x231   : > { %v1172_v37 = vpop.f32.mrf.mxu1  ;;  %v1525_v42 = vpop.f32.mrf.mxu0 }
 0x232   : > { %1809 = vst [vmem:[%s3170_s10 + $0x7f8] sm:$0xff] %v1169_v45  ;;  %1811 = vst [vmem:[%s3170_s10 + $0x808] sm:$0xff] %v1522_v29  ;;  %v1173_v49 = vadd.f32 %v1172_v37, %v3430_v44  ;;  %v1526_v54 = vadd.f32 %v1525_v42, %v3433_v47 }
 0x233   : > { %v1174_v62 = vpop.f32.mrf.mxu1  ;;  %v1527_v3 = vpop.f32.mrf.mxu0 }
 0x234   : > { %1814 = vst [vmem:[%s3170_s10 + $0x820] sm:$0xff] %v1173_v49  ;;  %1816 = vst [vmem:[%s3170_s10 + $0x830] sm:$0xff] %v1526_v54  ;;  %v1175_v24 = vadd.f32 %v1174_v62, %v3440_v13  ;;  %v1528_v11 = vadd.f32 %v1527_v3, %v3443_v22 }
 0x235   : > { %v1178_v17 = vpop.f32.mrf.mxu1  ;;  %v1531_v55 = vpop.f32.mrf.mxu0 }
 0x236   : > { %1815 = vst [vmem:[%s3170_s10 + $0x828] sm:$0xff] %v1175_v24  ;;  %1817 = vst [vmem:[%s3170_s10 + $0x838] sm:$0xff] %v1528_v11  ;;  %v1179_v27 = vadd.f32 %v1178_v17, %v3430_v44  ;;  %v1532_v34 = vadd.f32 %v1531_v55, %v3433_v47 }
 0x237   : > { %v1180_v2 = vpop.f32.mrf.mxu1  ;;  %v1533_v57 = vpop.f32.mrf.mxu0 }
 0x238   : > { %1820 = vst [vmem:[%s3170_s10 + $0x850] sm:$0xff] %v1179_v27  ;;  %1822 = vst [vmem:[%s3170_s10 + $0x860] sm:$0xff] %v1532_v34  ;;  %v1181_v63 = vadd.f32 %v1180_v2, %v3440_v13  ;;  %v1534_v5 = vadd.f32 %v1533_v57, %v3443_v22 }
 0x239   : > { %v1184_v21 = vpop.f32.mrf.mxu1  ;;  %v1537_v33 = vpop.f32.mrf.mxu0 }
 0x23a   : > { %1821 = vst [vmem:[%s3170_s10 + $0x858] sm:$0xff] %v1181_v63  ;;  %1823 = vst [vmem:[%s3170_s10 + $0x868] sm:$0xff] %v1534_v5  ;;  %v1185_v38 = vadd.f32 %v1184_v21, %v3430_v44  ;;  %v1538_v51 = vadd.f32 %v1537_v33, %v3433_v47 }
 0x23b   : > { %v1186_v59 = vpop.f32.mrf.mxu1  ;;  %v1539_v28 = vpop.f32.mrf.mxu0 }
 0x23c   : > { %1826 = vst [vmem:[%s3170_s10 + $0x880] sm:$0xff] %v1185_v38  ;;  %1828 = vst [vmem:[%s3170_s10 + $0x890] sm:$0xff] %v1538_v51  ;;  %v1187_v9 = vadd.f32 %v1186_v59, %v3440_v13  ;;  %v1540_v12 = vadd.f32 %v1539_v28, %v3443_v22 }
 0x23d   : > { %v1190_v20 = vpop.f32.mrf.mxu1  ;;  %v1543_v39 = vpop.f32.mrf.mxu0 }
 0x23e   : > { %1827 = vst [vmem:[%s3170_s10 + $0x888] sm:$0xff] %v1187_v9  ;;  %1829 = vst [vmem:[%s3170_s10 + $0x898] sm:$0xff] %v1540_v12  ;;  %v1191_v43 = vadd.f32 %v1190_v20, %v3430_v44  ;;  %v1544_v4 = vadd.f32 %v1543_v39, %v3433_v47 }
 0x23f   : > { %v1192_v16 = vpop.f32.mrf.mxu1  ;;  %v1545_v53 = vpop.f32.mrf.mxu0 }
 0x240   : > { %1832 = vst [vmem:[%s3170_s10 + $0x8b0] sm:$0xff] %v1191_v43  ;;  %1834 = vst [vmem:[%s3170_s10 + $0x8c0] sm:$0xff] %v1544_v4  ;;  %v1193_v35 = vadd.f32 %v1192_v16, %v3440_v13  ;;  %v1546_v61 = vadd.f32 %v1545_v53, %v3443_v22 }
 0x241   : > { %v1196_v7 = vpop.f32.mrf.mxu1  ;;  %v1549_v15 = vpop.f32.mrf.mxu0 }
 0x242   : > { %1833 = vst [vmem:[%s3170_s10 + $0x8b8] sm:$0xff] %v1193_v35  ;;  %1835 = vst [vmem:[%s3170_s10 + $0x8c8] sm:$0xff] %v1546_v61  ;;  %v1197_v25 = vadd.f32 %v1196_v7, %v3430_v44  ;;  %v1550_v31 = vadd.f32 %v1549_v15, %v3433_v47 }
 0x243   : > { %v1198_v32 = vpop.f32.mrf.mxu1  ;;  %v1551_v52 = vpop.f32.mrf.mxu0 }
 0x244   : > { %1838 = vst [vmem:[%s3170_s10 + $0x8e0] sm:$0xff] %v1197_v25  ;;  %1840 = vst [vmem:[%s3170_s10 + $0x8f0] sm:$0xff] %v1550_v31  ;;  %v1199_v48 = vadd.f32 %v1198_v32, %v3440_v13  ;;  %v1552_v44 = vadd.f32 %v1551_v52, %v3443_v22 }
 0x246   : > { %1839 = vst [vmem:[%s3170_s10 + $0x8e8] sm:$0xff] %v1199_v48  ;;  %1841 = vst [vmem:[%s3170_s10 + $0x8f8] sm:$0xff] %v1552_v44 }
 0x247   : > { %2089 = shalt.err (!%p2086_p3)
}
 0x248   : > { %s2090_s29 = scalar_lea.hbm %s3830_s19, 36864  ;;  %s2094_s5 = scalar_lea.hbm %s3885_s3, 110592 }
 0x249   : > { %p2091_p4 = scmp.ne.s32.totalorder %s3830_s19, %s2090_s29  ;;  %p2095_p9 = scmp.lt.s32.totalorder %s3830_s19, %s3885_s3 }
 0x24a   : > { %p2096_p10 = scmp.lt.s32.totalorder %s2094_s5, %s2090_s29 }
 0x24b   : > { %p2092_p7 = pnand %p2091_p4, %p2199_p5 }
 0x24c   : > { %p2097_p11 = por %p2096_p10, %p2095_p9 }
 0x24d   : > { %p2093_p8 = pneg %p2092_p7 }
 0x24f   : > { %p2098_p12 = pnand %p2097_p11, %p2093_p8 }
 0x251   : > { %2101 = shalt.err (!%p2098_p12)
}
 0x252   : > { %s2139_s8 = smov 768   ;;  %s2140_s9 = smov 48  }
 0x253   : > { %1995 = dma.vmem_to_hbm [thread:$0]  (%p2199_p5), %s3832_s11, 36864, %s3830_s19, %s3842_s20, %s2139_s8, %s2139_s8, %s2140_s9  }
 0x254 PF: > { %p2002_p13 = scmp.ge.s32.totalorder %s2136_s15, 2  ;;  %s1872_s10 = sand.u32 1, %s2124_s12  }
 0x255   : > { %s1873_s26 = scalar_lea.sflag [#allocation3], %s1872_s10 }
 0x256   : > { %p1998_p0 = pnand %p2002_p13, %p2203_p6 }
 0x258   : > { %p1999_p1 = pneg %p1998_p0 }
 0x25a   : > { %2119 = dma.done.wait (%p1999_p1), %s1873_s26, 36864  }
 0x25b   : > { %2121 = vsyncadd (%p1999_p1), %s1873_s26, 4294930432  ;;  %p13_p2 = scmp.ge.s32.totalorder %s2186_s18, 5   ;;  %s3892_s12 = smov %s2128_s13 }
 0x25c   : > { %s3893_s13 = smov %s2132_s14  ;;  %s3894_s14 = smov %s2197_s21 }
 0x25d   : > { %s3895_s15 = smov %s2186_s18  ;;  %15 = sbr.rel (!%p13_p2) target bundleno = 3 (0x3), region = 67 }
 0x262   :  { %1878 = vsyncpa [#allocation3], 1 }
 0x263   :  { %1880 = vsyncpa [#allocation3 + $0x1], 1 }

</bundles_post_ra>
